<compile_context>
chip_gen: v6e
topology: v6e:2x2x1
jax: 0.10.0
libtpu: 0.0.40
codegen_flags: <defaults>
</compile_context>

<pallas_src>
import math
import functools

import jax
import jax.numpy as jnp
from jax.experimental import pallas as pl
from jax.experimental.pallas import tpu as pltpu


# ----------------------------- Pallas kernel --------------------------------
def _transformer_block_kernel(
    x_ref, mask_ref,
    wq_ref, bq_ref, wk_ref, bk_ref, wv_ref, bv_ref, wo_ref, bo_ref,
    w1_ref, b1_ref, w2_ref, b2_ref,
    g1_ref, be1_ref, g2_ref, be2_ref,
    out_ref,
    k_sc, v_sc,
    *, num_heads: int, eps: float, q_block: int,
):
    T, D = x_ref.shape            # x_ref: (T, D) full sequence for this batch element
    H = num_heads
    dk = D // H
    TQ = q_block
    qi = pl.program_id(1)

    def layer_norm(v, gamma, beta):
        # torch: (x - mean) / (std_unbiased + eps) * a_2 + b_2
        mean = jnp.mean(v, axis=-1, keepdims=True)
        c = v - mean
        var_unbiased = jnp.sum(c * c, axis=-1, keepdims=True) * (1.0 / (D - 1))
        std = jnp.sqrt(var_unbiased)
        inv = pl.reciprocal(std + eps, approx=True)
        return gamma * c * inv + beta

    # ---- once per batch element: LN1(x) -> K, V caches (bf16, head-major) ----
    @pl.when(qi == 0)
    def _():
        xn_all = layer_norm(x_ref[...], g1_ref[0], be1_ref[0]).astype(jnp.bfloat16)
        k = jnp.dot(xn_all, wk_ref[...], preferred_element_type=jnp.float32) + bk_ref[0]
        v = jnp.dot(xn_all, wv_ref[...], preferred_element_type=jnp.float32) + bv_ref[0]
        k_sc[...] = jnp.transpose(k.reshape(T, H, dk), (1, 0, 2)).astype(jnp.bfloat16)
        v_sc[...] = jnp.transpose(v.reshape(T, H, dk), (1, 0, 2)).astype(jnp.bfloat16)

    q_start = pl.multiple_of(qi * TQ, TQ)
    rows = pl.ds(q_start, TQ)

    # ---------------- sublayer 0 on this query block ----------------
    xq = x_ref[rows, :]                                           # (TQ, D) f32
    xq_n = layer_norm(xq, g1_ref[0], be1_ref[0]).astype(jnp.bfloat16)
    q = jnp.dot(xq_n, wq_ref[...], preferred_element_type=jnp.float32) + bq_ref[0]
    qh = jnp.transpose(q.reshape(TQ, H, dk), (1, 0, 2)).astype(jnp.bfloat16)  # (H,TQ,dk)

    # scores kept in f32; mask applied once as an additive bias (not per-head select)
    scores = jnp.einsum("hqd,hkd->hqk", qh, k_sc[...],
                        preferred_element_type=jnp.float32) * (1.0 / math.sqrt(dk))
    bias = (mask_ref[...].astype(jnp.float32) - 1.0) * 1e9        # (TQ, T): 0 or -1e9
    scores = scores + bias[None, :, :]

    m = jnp.max(scores, axis=-1, keepdims=True)
    p = jnp.exp(scores - m)
    denom = jnp.sum(p, axis=-1, keepdims=True)
    p = p * pl.reciprocal(denom, approx=True)                     # softmax over keys

    ctx = jnp.einsum("hqk,hkd->hqd", p.astype(jnp.bfloat16), v_sc[...],
                     preferred_element_type=jnp.float32)          # (H, TQ, dk)
    ctx = jnp.transpose(ctx, (1, 0, 2)).reshape(TQ, D)            # merge heads

    attn_out = jnp.dot(ctx.astype(jnp.bfloat16), wo_ref[...],
                       preferred_element_type=jnp.float32) + bo_ref[0]
    y = xq + attn_out                                             # residual (f32)

    # ---------------- sublayer 1: y + FFN(LN2(y)) ----------------
    yn = layer_norm(y, g2_ref[0], be2_ref[0]).astype(jnp.bfloat16)
    h = jnp.dot(yn, w1_ref[...], preferred_element_type=jnp.float32) + b1_ref[0]
    h = jnp.maximum(h, 0.0).astype(jnp.bfloat16)                  # ReLU
    ff = jnp.dot(h, w2_ref[...], preferred_element_type=jnp.float32) + b2_ref[0]

    out_ref[...] = (y + ff).astype(out_ref.dtype)


# ------------------------------ wrapper --------------------------------------
def transformer_block(x, mask, params, *, num_heads, eps=1e-6, q_block=None):
    B, T, D = x.shape

    if q_block is None:
        q_block = T if T <= 128 else 128
    assert T % q_block == 0, "sequence length must be a multiple of the q block"
    assert q_block % 8 == 0 or q_block == T, "q block must be sublane-aligned"
    nq = T // q_block

    # bf16 weights feed the MXU (f32 accumulation in-kernel); biases / LN stay f32.
    bf16 = lambda w: w.astype(jnp.bfloat16)
    w = dict(params)
    for name in ("wq", "wk", "wv", "wo", "w1", "w2"):
        w[name] = bf16(params[name])

    in_specs = [
        pl.BlockSpec((None, T, D), lambda b, q: (b, 0, 0)),        # x: full seq per batch
        pl.BlockSpec((None, q_block, T), lambda b, q: (b, q, 0)),  # mask: this q block's rows
    ]
    weight_order = ["wq", "bq", "wk", "bk", "wv", "bv", "wo", "bo",
                    "w1", "b1", "w2", "b2", "g1", "be1", "g2", "be2"]
    weight_args = []
    for name in weight_order:
        arr = w[name]
        in_specs.append(pl.BlockSpec(arr.shape, lambda b, q: (0, 0)))
        weight_args.append(arr)

    H = num_heads
    dk = D // H
    kernel = functools.partial(_transformer_block_kernel,
                               num_heads=num_heads, eps=eps, q_block=q_block)

    return pl.pallas_call(
        kernel,
        out_shape=jax.ShapeDtypeStruct((B, T, D), x.dtype),
        grid_spec=pltpu.PrefetchScalarGridSpec(
            num_scalar_prefetch=0,
            grid=(B, nq),
            in_specs=in_specs,
            out_specs=pl.BlockSpec((None, q_block, D), lambda b, q: (b, q, 0)),
            scratch_shapes=[
                pltpu.VMEM((H, T, dk), jnp.bfloat16),   # K cache (head-major)
                pltpu.VMEM((H, T, dk), jnp.bfloat16),   # V cache (head-major)
            ],
        ),
        compiler_params=pltpu.CompilerParams(
            # batch axis parallel (megacore on v7x); q axis arbitrary so the per-batch
            # K/V scratch cache is carried correctly across q blocks.
            dimension_semantics=("parallel", "arbitrary"),
            vmem_limit_bytes=32 * 1024 * 1024,
        ),
    )(x, mask, *weight_args)


# --------------------------- pure-JAX reference -------------------------------
def _reference(x, mask, params, *, num_heads, eps=1e-6):
    B, T, D = x.shape
    H = num_heads
    dk = D // H

    def ln(v, g, b):
        mean = v.mean(-1, keepdims=True)
        std = jnp.sqrt(((v - mean) ** 2).sum(-1, keepdims=True) / (D - 1))
        return g * (v - mean) / (std + eps) + b

    xn = ln(x, params["g1"][0], params["be1"][0])
    q = xn @ params["wq"] + params["bq"][0]
    k = xn @ params["wk"] + params["bk"][0]
    v = xn @ params["wv"] + params["bv"][0]
    qh = q.reshape(B, T, H, dk).transpose(0, 2, 1, 3)
    kh = k.reshape(B, T, H, dk).transpose(0, 2, 1, 3)
    vh = v.reshape(B, T, H, dk).transpose(0, 2, 1, 3)
    scores = jnp.einsum("bhtd,bhsd->bhts", qh, kh) / math.sqrt(dk)
    scores = jnp.where(mask[:, None, :, :] == 0, -1e9, scores)
    attn = jax.nn.softmax(scores, axis=-1)
    ctx = jnp.einsum("bhts,bhsd->bhtd", attn, vh).transpose(0, 2, 1, 3).reshape(B, T, D)
    y = x + ctx @ params["wo"] + params["bo"][0]

    yn = ln(y, params["g2"][0], params["be2"][0])
    ff = jnp.maximum(yn @ params["w1"] + params["b1"][0], 0.0) @ params["w2"] + params["b2"][0]
    return y + ff


# --------------------------------- main ---------------------------------------
if __name__ == "__main__":
    B, T, D, H, D_FF = 2, 16, 32, 4, 64   # two query blocks of 8 -> exercises the q tiling

    key = jax.random.PRNGKey(0)
    keys = jax.random.split(key, 16)
    s = 0.02

    params = {
        "wq": s * jax.random.normal(keys[0], (D, D), jnp.float32),
        "bq": jnp.zeros((1, D), jnp.float32),
        "wk": s * jax.random.normal(keys[1], (D, D), jnp.float32),
        "bk": jnp.zeros((1, D), jnp.float32),
        "wv": s * jax.random.normal(keys[2], (D, D), jnp.float32),
        "bv": jnp.zeros((1, D), jnp.float32),
        "wo": s * jax.random.normal(keys[3], (D, D), jnp.float32),
        "bo": jnp.zeros((1, D), jnp.float32),
        "w1": s * jax.random.normal(keys[4], (D, D_FF), jnp.float32),
        "b1": jnp.zeros((1, D_FF), jnp.float32),
        "w2": s * jax.random.normal(keys[5], (D_FF, D), jnp.float32),
        "b2": jnp.zeros((1, D), jnp.float32),
        "g1": jnp.ones((1, D), jnp.float32),    # LayerNorm a_2 (sublayer 0)
        "be1": jnp.zeros((1, D), jnp.float32),  # LayerNorm b_2 (sublayer 0)
        "g2": jnp.ones((1, D), jnp.float32),    # LayerNorm a_2 (sublayer 1)
        "be2": jnp.zeros((1, D), jnp.float32),  # LayerNorm b_2 (sublayer 1)
    }

    x = jax.random.normal(keys[6], (B, T, D), jnp.float32)
    # causal mask, broadcast over batch (1 = attend, 0 = masked)
    causal = jnp.tril(jnp.ones((T, T), jnp.float32))
    mask = jnp.broadcast_to(causal, (B, T, T))

    out = transformer_block(x, mask, params, num_heads=H, q_block=8)
    out = jax.block_until_ready(out)

    ref = _reference(x, mask, params, num_heads=H)
    assert out.shape == (B, T, D)
    # bf16 MXU operands + approx reciprocals => compare with a bf16-level tolerance.
    assert jnp.allclose(out, ref, atol=5e-3, rtol=5e-3), "mismatch vs JAX reference"

    print("KERNEL_OK")
</pallas_src>

<mosaic_0001>
module attributes {stable_mosaic.version = 11 : i64} {
  func.func @_transformer_block_kernel(%arg0: i32, %arg1: i32, %arg2: memref<1x16x32xf32, #tpu.memory_space<vmem>>, %arg3: memref<1x8x16xf32, #tpu.memory_space<vmem>>, %arg4: memref<32x32xbf16, #tpu.memory_space<vmem>>, %arg5: memref<1x32xf32, #tpu.memory_space<vmem>>, %arg6: memref<32x32xbf16, #tpu.memory_space<vmem>>, %arg7: memref<1x32xf32, #tpu.memory_space<vmem>>, %arg8: memref<32x32xbf16, #tpu.memory_space<vmem>>, %arg9: memref<1x32xf32, #tpu.memory_space<vmem>>, %arg10: memref<32x32xbf16, #tpu.memory_space<vmem>>, %arg11: memref<1x32xf32, #tpu.memory_space<vmem>>, %arg12: memref<32x64xbf16, #tpu.memory_space<vmem>>, %arg13: memref<1x64xf32, #tpu.memory_space<vmem>>, %arg14: memref<64x32xbf16, #tpu.memory_space<vmem>>, %arg15: memref<1x32xf32, #tpu.memory_space<vmem>>, %arg16: memref<1x32xf32, #tpu.memory_space<vmem>>, %arg17: memref<1x32xf32, #tpu.memory_space<vmem>>, %arg18: memref<1x32xf32, #tpu.memory_space<vmem>>, %arg19: memref<1x32xf32, #tpu.memory_space<vmem>>, %arg20: memref<1x8x32xf32, #tpu.memory_space<vmem>>, %arg21: memref<4x16x8xbf16, #tpu.memory_space<vmem>>, %arg22: memref<4x16x8xbf16, #tpu.memory_space<vmem>>) attributes {dimension_semantics = [#tpu.dimension_semantics<parallel>, #tpu.dimension_semantics<arbitrary>], iteration_bounds = array<i64: 2, 2>, scalar_prefetch = 0 : i64, scratch_operands = 2 : i64, tpu.core_type = #tpu.core_type<tc>, window_params = [{transform_indices = @transform_0, window_bounds = array<i64: 1, 16, 32>}, {transform_indices = @transform_1, window_bounds = array<i64: 1, 8, 16>}, {pipeline_mode = #tpu.pipeline_mode<synchronous>, transform_indices = @transform_2, window_bounds = array<i64: 32, 32>}, {pipeline_mode = #tpu.pipeline_mode<synchronous>, transform_indices = @transform_3, window_bounds = array<i64: 1, 32>}, {pipeline_mode = #tpu.pipeline_mode<synchronous>, transform_indices = @transform_4, window_bounds = array<i64: 32, 32>}, {pipeline_mode = #tpu.pipeline_mode<synchronous>, transform_indices = @transform_5, window_bounds = array<i64: 1, 32>}, {pipeline_mode = #tpu.pipeline_mode<synchronous>, transform_indices = @transform_6, window_bounds = array<i64: 32, 32>}, {pipeline_mode = #tpu.pipeline_mode<synchronous>, transform_indices = @transform_7, window_bounds = array<i64: 1, 32>}, {pipeline_mode = #tpu.pipeline_mode<synchronous>, transform_indices = @transform_8, window_bounds = array<i64: 32, 32>}, {pipeline_mode = #tpu.pipeline_mode<synchronous>, transform_indices = @transform_9, window_bounds = array<i64: 1, 32>}, {pipeline_mode = #tpu.pipeline_mode<synchronous>, transform_indices = @transform_10, window_bounds = array<i64: 32, 64>}, {pipeline_mode = #tpu.pipeline_mode<synchronous>, transform_indices = @transform_11, window_bounds = array<i64: 1, 64>}, {pipeline_mode = #tpu.pipeline_mode<synchronous>, transform_indices = @transform_12, window_bounds = array<i64: 64, 32>}, {pipeline_mode = #tpu.pipeline_mode<synchronous>, transform_indices = @transform_13, window_bounds = array<i64: 1, 32>}, {pipeline_mode = #tpu.pipeline_mode<synchronous>, transform_indices = @transform_14, window_bounds = array<i64: 1, 32>}, {pipeline_mode = #tpu.pipeline_mode<synchronous>, transform_indices = @transform_15, window_bounds = array<i64: 1, 32>}, {pipeline_mode = #tpu.pipeline_mode<synchronous>, transform_indices = @transform_16, window_bounds = array<i64: 1, 32>}, {pipeline_mode = #tpu.pipeline_mode<synchronous>, transform_indices = @transform_17, window_bounds = array<i64: 1, 32>}, {transform_indices = @transform_18, window_bounds = array<i64: 1, 8, 32>}]} {
    %c0_i32 = arith.constant 0 : i32
    %0 = arith.cmpi eq, %arg1, %c0_i32 : i32
    %1 = arith.extui %0 : i1 to i32
    %c0_i32_0 = arith.constant 0 : i32
    %2 = arith.cmpi ne, %1, %c0_i32_0 : i32
    scf.if %2 {
      %c0_59 = arith.constant 0 : index
      %c0_60 = arith.constant 0 : index
      %c0_61 = arith.constant 0 : index
      %132 = vector.load %arg2[%c0_59, %c0_60, %c0_61] : memref<1x16x32xf32, #tpu.memory_space<vmem>>, vector<1x16x32xf32>
      %133 = vector.shape_cast %132 : vector<1x16x32xf32> to vector<16x32xf32>
      %c0_62 = arith.constant 0 : index
      %c0_63 = arith.constant 0 : index
      %134 = vector.load %arg16[%c0_62, %c0_63] : memref<1x32xf32, #tpu.memory_space<vmem>>, vector<1x32xf32>
      %135 = vector.shape_cast %134 : vector<1x32xf32> to vector<32xf32>
      %c0_64 = arith.constant 0 : index
      %c0_65 = arith.constant 0 : index
      %136 = vector.load %arg17[%c0_64, %c0_65] : memref<1x32xf32, #tpu.memory_space<vmem>>, vector<1x32xf32>
      %137 = vector.shape_cast %136 : vector<1x32xf32> to vector<32xf32>
      %cst_66 = arith.constant dense<0.000000e+00> : vector<16xf32>
      %138 = vector.multi_reduction <add>, %133, %cst_66 [1] : vector<16x32xf32> to vector<16xf32>
      %139 = vector.shape_cast %138 : vector<16xf32> to vector<16x1xf32>
      %cst_67 = arith.constant 3.200000e+01 : f32
      %140 = vector.broadcast %cst_67 : f32 to vector<16x1xf32>
      %141 = arith.divf %139, %140 : vector<16x1xf32>
      %142 = vector.broadcast %141 : vector<16x1xf32> to vector<16x32xf32>
      %143 = arith.subf %133, %142 : vector<16x32xf32>
      %144 = arith.mulf %143, %143 : vector<16x32xf32>
      %cst_68 = arith.constant dense<0.000000e+00> : vector<16xf32>
      %145 = vector.multi_reduction <add>, %144, %cst_68 [1] : vector<16x32xf32> to vector<16xf32>
      %146 = vector.shape_cast %145 : vector<16xf32> to vector<16x1xf32>
      %cst_69 = arith.constant 0.0322580636 : f32
      %147 = vector.broadcast %cst_69 : f32 to vector<16x1xf32>
      %148 = arith.mulf %146, %147 : vector<16x1xf32>
      %149 = math.sqrt %148 : vector<16x1xf32>
      %cst_70 = arith.constant 9.99999997E-7 : f32
      %150 = vector.broadcast %cst_70 : f32 to vector<16x1xf32>
      %151 = arith.addf %149, %150 : vector<16x1xf32>
      %152 = tpu.reciprocal %151 {approx = true} : vector<16x1xf32> -> vector<16x1xf32>
      %153 = vector.shape_cast %135 : vector<32xf32> to vector<1x32xf32>
      %154 = vector.broadcast %153 : vector<1x32xf32> to vector<16x32xf32>
      %155 = arith.mulf %154, %143 : vector<16x32xf32>
      %156 = vector.broadcast %152 : vector<16x1xf32> to vector<16x32xf32>
      %157 = arith.mulf %155, %156 : vector<16x32xf32>
      %158 = vector.shape_cast %137 : vector<32xf32> to vector<1x32xf32>
      %159 = vector.broadcast %158 : vector<1x32xf32> to vector<16x32xf32>
      %160 = arith.addf %157, %159 : vector<16x32xf32>
      %161 = arith.truncf %160 : vector<16x32xf32> to vector<16x32xbf16>
      %c0_71 = arith.constant 0 : index
      %c0_72 = arith.constant 0 : index
      %162 = vector.load %arg6[%c0_71, %c0_72] : memref<32x32xbf16, #tpu.memory_space<vmem>>, vector<32x32xbf16>
      %cst_73 = arith.constant dense<0.000000e+00> : vector<16x32xf32>
      %163 = tpu.matmul %161, %162, %cst_73 {dimension_numbers = #tpu.dot_dimension_numbers<[1], [0], [0], [1], [0, 0, 1, 1], [], []>} : vector<16x32xbf16>, vector<32x32xbf16>, vector<16x32xf32> -> vector<16x32xf32>
      %c0_74 = arith.constant 0 : index
      %c0_75 = arith.constant 0 : index
      %164 = vector.load %arg7[%c0_74, %c0_75] : memref<1x32xf32, #tpu.memory_space<vmem>>, vector<1x32xf32>
      %165 = vector.shape_cast %164 : vector<1x32xf32> to vector<32xf32>
      %166 = vector.shape_cast %165 : vector<32xf32> to vector<1x32xf32>
      %167 = vector.broadcast %166 : vector<1x32xf32> to vector<16x32xf32>
      %168 = arith.addf %163, %167 : vector<16x32xf32>
      %c0_76 = arith.constant 0 : index
      %c0_77 = arith.constant 0 : index
      %169 = vector.load %arg8[%c0_76, %c0_77] : memref<32x32xbf16, #tpu.memory_space<vmem>>, vector<32x32xbf16>
      %cst_78 = arith.constant dense<0.000000e+00> : vector<16x32xf32>
      %170 = tpu.matmul %161, %169, %cst_78 {dimension_numbers = #tpu.dot_dimension_numbers<[1], [0], [0], [1], [0, 0, 1, 1], [], []>} : vector<16x32xbf16>, vector<32x32xbf16>, vector<16x32xf32> -> vector<16x32xf32>
      %c0_79 = arith.constant 0 : index
      %c0_80 = arith.constant 0 : index
      %171 = vector.load %arg9[%c0_79, %c0_80] : memref<1x32xf32, #tpu.memory_space<vmem>>, vector<1x32xf32>
      %172 = vector.shape_cast %171 : vector<1x32xf32> to vector<32xf32>
      %173 = vector.shape_cast %172 : vector<32xf32> to vector<1x32xf32>
      %174 = vector.broadcast %173 : vector<1x32xf32> to vector<16x32xf32>
      %175 = arith.addf %170, %174 : vector<16x32xf32>
      %176 = vector.shape_cast %168 : vector<16x32xf32> to vector<16x4x8xf32>
      %177 = tpu.transpose %176, [1, 0, 2] : vector<16x4x8xf32> -> vector<4x16x8xf32>
      %178 = arith.truncf %177 : vector<4x16x8xf32> to vector<4x16x8xbf16>
      %c0_81 = arith.constant 0 : index
      %c0_82 = arith.constant 0 : index
      %c0_83 = arith.constant 0 : index
      %179 = vector.load %arg21[%c0_81, %c0_82, %c0_83] : memref<4x16x8xbf16, #tpu.memory_space<vmem>>, vector<4x16x8xbf16>
      tpu.vector_store %arg21[%c0_81, %c0_82, %c0_83], %178 {strides = array<i32>} : memref<4x16x8xbf16, #tpu.memory_space<vmem>>, vector<4x16x8xbf16>,
      %180 = vector.shape_cast %175 : vector<16x32xf32> to vector<16x4x8xf32>
      %181 = tpu.transpose %180, [1, 0, 2] : vector<16x4x8xf32> -> vector<4x16x8xf32>
      %182 = arith.truncf %181 : vector<4x16x8xf32> to vector<4x16x8xbf16>
      %c0_84 = arith.constant 0 : index
      %c0_85 = arith.constant 0 : index
      %c0_86 = arith.constant 0 : index
      %183 = vector.load %arg22[%c0_84, %c0_85, %c0_86] : memref<4x16x8xbf16, #tpu.memory_space<vmem>>, vector<4x16x8xbf16>
      tpu.vector_store %arg22[%c0_84, %c0_85, %c0_86], %182 {strides = array<i32>} : memref<4x16x8xbf16, #tpu.memory_space<vmem>>, vector<4x16x8xbf16>,
    } else {
    }
    %c8_i32 = arith.constant 8 : i32
    %3 = arith.muli %arg1, %c8_i32 : i32
    %4 = tpu.assume_multiple %3, 8 : i32
    %c0 = arith.constant 0 : index
    %5 = arith.index_cast %4 : i32 to index
    %c0_1 = arith.constant 0 : index
    %6 = vector.load %arg2[%c0, %5, %c0_1] : memref<1x16x32xf32, #tpu.memory_space<vmem>>, vector<1x8x32xf32>
    %7 = vector.shape_cast %6 : vector<1x8x32xf32> to vector<8x32xf32>
    %c0_2 = arith.constant 0 : index
    %c0_3 = arith.constant 0 : index
    %8 = vector.load %arg16[%c0_2, %c0_3] : memref<1x32xf32, #tpu.memory_space<vmem>>, vector<1x32xf32>
    %9 = vector.shape_cast %8 : vector<1x32xf32> to vector<32xf32>
    %c0_4 = arith.constant 0 : index
    %c0_5 = arith.constant 0 : index
    %10 = vector.load %arg17[%c0_4, %c0_5] : memref<1x32xf32, #tpu.memory_space<vmem>>, vector<1x32xf32>
    %11 = vector.shape_cast %10 : vector<1x32xf32> to vector<32xf32>
    %cst = arith.constant dense<0.000000e+00> : vector<8xf32>
    %12 = vector.multi_reduction <add>, %7, %cst [1] : vector<8x32xf32> to vector<8xf32>
    %13 = vector.shape_cast %12 : vector<8xf32> to vector<8x1xf32>
    %cst_6 = arith.constant 3.200000e+01 : f32
    %14 = vector.broadcast %cst_6 : f32 to vector<8x1xf32>
    %15 = arith.divf %13, %14 : vector<8x1xf32>
    %16 = vector.broadcast %15 : vector<8x1xf32> to vector<8x32xf32>
    %17 = arith.subf %7, %16 : vector<8x32xf32>
    %18 = arith.mulf %17, %17 : vector<8x32xf32>
    %cst_7 = arith.constant dense<0.000000e+00> : vector<8xf32>
    %19 = vector.multi_reduction <add>, %18, %cst_7 [1] : vector<8x32xf32> to vector<8xf32>
    %20 = vector.shape_cast %19 : vector<8xf32> to vector<8x1xf32>
    %cst_8 = arith.constant 0.0322580636 : f32
    %21 = vector.broadcast %cst_8 : f32 to vector<8x1xf32>
    %22 = arith.mulf %20, %21 : vector<8x1xf32>
    %23 = math.sqrt %22 : vector<8x1xf32>
    %cst_9 = arith.constant 9.99999997E-7 : f32
    %24 = vector.broadcast %cst_9 : f32 to vector<8x1xf32>
    %25 = arith.addf %23, %24 : vector<8x1xf32>
    %26 = tpu.reciprocal %25 {approx = true} : vector<8x1xf32> -> vector<8x1xf32>
    %27 = vector.shape_cast %9 : vector<32xf32> to vector<1x32xf32>
    %28 = vector.broadcast %27 : vector<1x32xf32> to vector<8x32xf32>
    %29 = arith.mulf %28, %17 : vector<8x32xf32>
    %30 = vector.broadcast %26 : vector<8x1xf32> to vector<8x32xf32>
    %31 = arith.mulf %29, %30 : vector<8x32xf32>
    %32 = vector.shape_cast %11 : vector<32xf32> to vector<1x32xf32>
    %33 = vector.broadcast %32 : vector<1x32xf32> to vector<8x32xf32>
    %34 = arith.addf %31, %33 : vector<8x32xf32>
    %35 = arith.truncf %34 : vector<8x32xf32> to vector<8x32xbf16>
    %c0_10 = arith.constant 0 : index
    %c0_11 = arith.constant 0 : index
    %36 = vector.load %arg4[%c0_10, %c0_11] : memref<32x32xbf16, #tpu.memory_space<vmem>>, vector<32x32xbf16>
    %cst_12 = arith.constant dense<0.000000e+00> : vector<8x32xf32>
    %37 = tpu.matmul %35, %36, %cst_12 {dimension_numbers = #tpu.dot_dimension_numbers<[1], [0], [0], [1], [0, 0, 1, 1], [], []>} : vector<8x32xbf16>, vector<32x32xbf16>, vector<8x32xf32> -> vector<8x32xf32>
    %c0_13 = arith.constant 0 : index
    %c0_14 = arith.constant 0 : index
    %38 = vector.load %arg5[%c0_13, %c0_14] : memref<1x32xf32, #tpu.memory_space<vmem>>, vector<1x32xf32>
    %39 = vector.shape_cast %38 : vector<1x32xf32> to vector<32xf32>
    %40 = vector.shape_cast %39 : vector<32xf32> to vector<1x32xf32>
    %41 = vector.broadcast %40 : vector<1x32xf32> to vector<8x32xf32>
    %42 = arith.addf %37, %41 : vector<8x32xf32>
    %43 = vector.shape_cast %42 : vector<8x32xf32> to vector<8x4x8xf32>
    %44 = tpu.transpose %43, [1, 0, 2] : vector<8x4x8xf32> -> vector<4x8x8xf32>
    %45 = arith.truncf %44 : vector<4x8x8xf32> to vector<4x8x8xbf16>
    %c0_15 = arith.constant 0 : index
    %c0_16 = arith.constant 0 : index
    %c0_17 = arith.constant 0 : index
    %46 = vector.load %arg21[%c0_15, %c0_16, %c0_17] : memref<4x16x8xbf16, #tpu.memory_space<vmem>>, vector<4x16x8xbf16>
    "tpu.trace_start"() <{level = 10 : i32, message = "hqd,hkd->hqk"}> : () -> ()
    %cst_18 = arith.constant dense<0.000000e+00> : vector<4x8x16xf32>
    %47 = tpu.matmul %45, %46, %cst_18 {dimension_numbers = #tpu.dot_dimension_numbers<[2], [2], [1], [1], [0, 0, 0, 1, 1, 1], [0], [0]>} : vector<4x8x8xbf16>, vector<4x16x8xbf16>, vector<4x8x16xf32> -> vector<4x8x16xf32>
    "tpu.trace_stop"() : () -> ()
    %cst_19 = arith.constant 0.353553385 : f32
    %48 = vector.broadcast %cst_19 : f32 to vector<4x8x16xf32>
    %49 = arith.mulf %47, %48 : vector<4x8x16xf32>
    %c0_20 = arith.constant 0 : index
    %c0_21 = arith.constant 0 : index
    %c0_22 = arith.constant 0 : index
    %50 = vector.load %arg3[%c0_20, %c0_21, %c0_22] : memref<1x8x16xf32, #tpu.memory_space<vmem>>, vector<1x8x16xf32>
    %51 = vector.shape_cast %50 : vector<1x8x16xf32> to vector<8x16xf32>
    %cst_23 = arith.constant 1.000000e+00 : f32
    %52 = vector.broadcast %cst_23 : f32 to vector<8x16xf32>
    %53 = arith.subf %51, %52 : vector<8x16xf32>
    %cst_24 = arith.constant 1.000000e+09 : f32
    %54 = vector.broadcast %cst_24 : f32 to vector<8x16xf32>
    %55 = arith.mulf %53, %54 : vector<8x16xf32>
    %56 = vector.shape_cast %55 : vector<8x16xf32> to vector<1x8x16xf32>
    %57 = vector.broadcast %56 : vector<1x8x16xf32> to vector<4x8x16xf32>
    %58 = arith.addf %49, %57 : vector<4x8x16xf32>
    %cst_25 = arith.constant dense<0xFF800000> : vector<4x8xf32>
    %59 = vector.multi_reduction <maximumf>, %58, %cst_25 [2] : vector<4x8x16xf32> to vector<4x8xf32>
    %60 = vector.shape_cast %59 : vector<4x8xf32> to vector<4x8x1xf32>
    %61 = vector.broadcast %60 : vector<4x8x1xf32> to vector<4x8x16xf32>
    %62 = arith.subf %58, %61 : vector<4x8x16xf32>
    %63 = math.exp %62 : vector<4x8x16xf32>
    %cst_26 = arith.constant dense<0.000000e+00> : vector<4x8xf32>
    %64 = vector.multi_reduction <add>, %63, %cst_26 [2] : vector<4x8x16xf32> to vector<4x8xf32>
    %65 = vector.shape_cast %64 : vector<4x8xf32> to vector<4x8x1xf32>
    %66 = tpu.reciprocal %65 {approx = true} : vector<4x8x1xf32> -> vector<4x8x1xf32>
    %67 = vector.broadcast %66 : vector<4x8x1xf32> to vector<4x8x16xf32>
    %68 = arith.mulf %63, %67 : vector<4x8x16xf32>
    %69 = arith.truncf %68 : vector<4x8x16xf32> to vector<4x8x16xbf16>
    %c0_27 = arith.constant 0 : index
    %c0_28 = arith.constant 0 : index
    %c0_29 = arith.constant 0 : index
    %70 = vector.load %arg22[%c0_27, %c0_28, %c0_29] : memref<4x16x8xbf16, #tpu.memory_space<vmem>>, vector<4x16x8xbf16>
    "tpu.trace_start"() <{level = 10 : i32, message = "hqk,hkd->hqd"}> : () -> ()
    %cst_30 = arith.constant dense<0.000000e+00> : vector<4x8x8xf32>
    %71 = tpu.matmul %69, %70, %cst_30 {dimension_numbers = #tpu.dot_dimension_numbers<[2], [1], [1], [2], [0, 0, 0, 1, 1, 2], [0], [0]>} : vector<4x8x16xbf16>, vector<4x16x8xbf16>, vector<4x8x8xf32> -> vector<4x8x8xf32>
    "tpu.trace_stop"() : () -> ()
    %72 = tpu.transpose %71, [1, 0, 2] : vector<4x8x8xf32> -> vector<8x4x8xf32>
    %73 = vector.shape_cast %72 : vector<8x4x8xf32> to vector<8x32xf32>
    %74 = arith.truncf %73 : vector<8x32xf32> to vector<8x32xbf16>
    %c0_31 = arith.constant 0 : index
    %c0_32 = arith.constant 0 : index
    %75 = vector.load %arg10[%c0_31, %c0_32] : memref<32x32xbf16, #tpu.memory_space<vmem>>, vector<32x32xbf16>
    %cst_33 = arith.constant dense<0.000000e+00> : vector<8x32xf32>
    %76 = tpu.matmul %74, %75, %cst_33 {dimension_numbers = #tpu.dot_dimension_numbers<[1], [0], [0], [1], [0, 0, 1, 1], [], []>} : vector<8x32xbf16>, vector<32x32xbf16>, vector<8x32xf32> -> vector<8x32xf32>
    %c0_34 = arith.constant 0 : index
    %c0_35 = arith.constant 0 : index
    %77 = vector.load %arg11[%c0_34, %c0_35] : memref<1x32xf32, #tpu.memory_space<vmem>>, vector<1x32xf32>
    %78 = vector.shape_cast %77 : vector<1x32xf32> to vector<32xf32>
    %79 = vector.shape_cast %78 : vector<32xf32> to vector<1x32xf32>
    %80 = vector.broadcast %79 : vector<1x32xf32> to vector<8x32xf32>
    %81 = arith.addf %76, %80 : vector<8x32xf32>
    %82 = arith.addf %7, %81 : vector<8x32xf32>
    %c0_36 = arith.constant 0 : index
    %c0_37 = arith.constant 0 : index
    %83 = vector.load %arg18[%c0_36, %c0_37] : memref<1x32xf32, #tpu.memory_space<vmem>>, vector<1x32xf32>
    %84 = vector.shape_cast %83 : vector<1x32xf32> to vector<32xf32>
    %c0_38 = arith.constant 0 : index
    %c0_39 = arith.constant 0 : index
    %85 = vector.load %arg19[%c0_38, %c0_39] : memref<1x32xf32, #tpu.memory_space<vmem>>, vector<1x32xf32>
    %86 = vector.shape_cast %85 : vector<1x32xf32> to vector<32xf32>
    %cst_40 = arith.constant dense<0.000000e+00> : vector<8xf32>
    %87 = vector.multi_reduction <add>, %82, %cst_40 [1] : vector<8x32xf32> to vector<8xf32>
    %88 = vector.shape_cast %87 : vector<8xf32> to vector<8x1xf32>
    %cst_41 = arith.constant 3.200000e+01 : f32
    %89 = vector.broadcast %cst_41 : f32 to vector<8x1xf32>
    %90 = arith.divf %88, %89 : vector<8x1xf32>
    %91 = vector.broadcast %90 : vector<8x1xf32> to vector<8x32xf32>
    %92 = arith.subf %82, %91 : vector<8x32xf32>
    %93 = arith.mulf %92, %92 : vector<8x32xf32>
    %cst_42 = arith.constant dense<0.000000e+00> : vector<8xf32>
    %94 = vector.multi_reduction <add>, %93, %cst_42 [1] : vector<8x32xf32> to vector<8xf32>
    %95 = vector.shape_cast %94 : vector<8xf32> to vector<8x1xf32>
    %cst_43 = arith.constant 0.0322580636 : f32
    %96 = vector.broadcast %cst_43 : f32 to vector<8x1xf32>
    %97 = arith.mulf %95, %96 : vector<8x1xf32>
    %98 = math.sqrt %97 : vector<8x1xf32>
    %cst_44 = arith.constant 9.99999997E-7 : f32
    %99 = vector.broadcast %cst_44 : f32 to vector<8x1xf32>
    %100 = arith.addf %98, %99 : vector<8x1xf32>
    %101 = tpu.reciprocal %100 {approx = true} : vector<8x1xf32> -> vector<8x1xf32>
    %102 = vector.shape_cast %84 : vector<32xf32> to vector<1x32xf32>
    %103 = vector.broadcast %102 : vector<1x32xf32> to vector<8x32xf32>
    %104 = arith.mulf %103, %92 : vector<8x32xf32>
    %105 = vector.broadcast %101 : vector<8x1xf32> to vector<8x32xf32>
    %106 = arith.mulf %104, %105 : vector<8x32xf32>
    %107 = vector.shape_cast %86 : vector<32xf32> to vector<1x32xf32>
    %108 = vector.broadcast %107 : vector<1x32xf32> to vector<8x32xf32>
    %109 = arith.addf %106, %108 : vector<8x32xf32>
    %110 = arith.truncf %109 : vector<8x32xf32> to vector<8x32xbf16>
    %c0_45 = arith.constant 0 : index
    %c0_46 = arith.constant 0 : index
    %111 = vector.load %arg12[%c0_45, %c0_46] : memref<32x64xbf16, #tpu.memory_space<vmem>>, vector<32x64xbf16>
    %cst_47 = arith.constant dense<0.000000e+00> : vector<8x64xf32>
    %112 = tpu.matmul %110, %111, %cst_47 {dimension_numbers = #tpu.dot_dimension_numbers<[1], [0], [0], [1], [0, 0, 1, 1], [], []>} : vector<8x32xbf16>, vector<32x64xbf16>, vector<8x64xf32> -> vector<8x64xf32>
    %c0_48 = arith.constant 0 : index
    %c0_49 = arith.constant 0 : index
    %113 = vector.load %arg13[%c0_48, %c0_49] : memref<1x64xf32, #tpu.memory_space<vmem>>, vector<1x64xf32>
    %114 = vector.shape_cast %113 : vector<1x64xf32> to vector<64xf32>
    %115 = vector.shape_cast %114 : vector<64xf32> to vector<1x64xf32>
    %116 = vector.broadcast %115 : vector<1x64xf32> to vector<8x64xf32>
    %117 = arith.addf %112, %116 : vector<8x64xf32>
    %cst_50 = arith.constant 0.000000e+00 : f32
    %118 = vector.broadcast %cst_50 : f32 to vector<8x64xf32>
    %119 = arith.maximumf %117, %118 : vector<8x64xf32>
    %120 = arith.truncf %119 : vector<8x64xf32> to vector<8x64xbf16>
    %c0_51 = arith.constant 0 : index
    %c0_52 = arith.constant 0 : index
    %121 = vector.load %arg14[%c0_51, %c0_52] : memref<64x32xbf16, #tpu.memory_space<vmem>>, vector<64x32xbf16>
    %cst_53 = arith.constant dense<0.000000e+00> : vector<8x32xf32>
    %122 = tpu.matmul %120, %121, %cst_53 {dimension_numbers = #tpu.dot_dimension_numbers<[1], [0], [0], [1], [0, 0, 1, 1], [], []>} : vector<8x64xbf16>, vector<64x32xbf16>, vector<8x32xf32> -> vector<8x32xf32>
    %c0_54 = arith.constant 0 : index
    %c0_55 = arith.constant 0 : index
    %123 = vector.load %arg15[%c0_54, %c0_55] : memref<1x32xf32, #tpu.memory_space<vmem>>, vector<1x32xf32>
    %124 = vector.shape_cast %123 : vector<1x32xf32> to vector<32xf32>
    %125 = vector.shape_cast %124 : vector<32xf32> to vector<1x32xf32>
    %126 = vector.broadcast %125 : vector<1x32xf32> to vector<8x32xf32>
    %127 = arith.addf %122, %126 : vector<8x32xf32>
    %128 = arith.addf %82, %127 : vector<8x32xf32>
    %c0_56 = arith.constant 0 : index
    %c0_57 = arith.constant 0 : index
    %c0_58 = arith.constant 0 : index
    %129 = vector.load %arg20[%c0_56, %c0_57, %c0_58] : memref<1x8x32xf32, #tpu.memory_space<vmem>>, vector<1x8x32xf32>
    %130 = vector.shape_cast %129 : vector<1x8x32xf32> to vector<8x32xf32>
    %131 = vector.shape_cast %128 : vector<8x32xf32> to vector<1x8x32xf32>
    tpu.vector_store %arg20[%c0_56, %c0_57, %c0_58], %131 {strides = array<i32>} : memref<1x8x32xf32, #tpu.memory_space<vmem>>, vector<1x8x32xf32>,
    return
  }
  func.func @transform_0(%arg0: i32, %arg1: i32) -> (i32, i32, i32) {
    %c0_i32 = arith.constant 0 : i32
    %c0_i32_0 = arith.constant 0 : i32
    %c0_i32_1 = arith.constant 0 : i32
    return %arg0, %c0_i32, %c0_i32_0 : i32, i32, i32
  }
  func.func @transform_1(%arg0: i32, %arg1: i32) -> (i32, i32, i32) {
    %c0_i32 = arith.constant 0 : i32
    %c0_i32_0 = arith.constant 0 : i32
    return %arg0, %arg1, %c0_i32 : i32, i32, i32
  }
  func.func @transform_2(%arg0: i32, %arg1: i32) -> (i32, i32) {
    %c0_i32 = arith.constant 0 : i32
    %c0_i32_0 = arith.constant 0 : i32
    %c0_i32_1 = arith.constant 0 : i32
    return %c0_i32, %c0_i32_0 : i32, i32
  }
  func.func @transform_3(%arg0: i32, %arg1: i32) -> (i32, i32) {
    %c0_i32 = arith.constant 0 : i32
    %c0_i32_0 = arith.constant 0 : i32
    %c0_i32_1 = arith.constant 0 : i32
    return %c0_i32, %c0_i32_0 : i32, i32
  }
  func.func @transform_4(%arg0: i32, %arg1: i32) -> (i32, i32) {
    %c0_i32 = arith.constant 0 : i32
    %c0_i32_0 = arith.constant 0 : i32
    %c0_i32_1 = arith.constant 0 : i32
    return %c0_i32, %c0_i32_0 : i32, i32
  }
  func.func @transform_5(%arg0: i32, %arg1: i32) -> (i32, i32) {
    %c0_i32 = arith.constant 0 : i32
    %c0_i32_0 = arith.constant 0 : i32
    %c0_i32_1 = arith.constant 0 : i32
    return %c0_i32, %c0_i32_0 : i32, i32
  }
  func.func @transform_6(%arg0: i32, %arg1: i32) -> (i32, i32) {
    %c0_i32 = arith.constant 0 : i32
    %c0_i32_0 = arith.constant 0 : i32
    %c0_i32_1 = arith.constant 0 : i32
    return %c0_i32, %c0_i32_0 : i32, i32
  }
  func.func @transform_7(%arg0: i32, %arg1: i32) -> (i32, i32) {
    %c0_i32 = arith.constant 0 : i32
    %c0_i32_0 = arith.constant 0 : i32
    %c0_i32_1 = arith.constant 0 : i32
    return %c0_i32, %c0_i32_0 : i32, i32
  }
  func.func @transform_8(%arg0: i32, %arg1: i32) -> (i32, i32) {
    %c0_i32 = arith.constant 0 : i32
    %c0_i32_0 = arith.constant 0 : i32
    %c0_i32_1 = arith.constant 0 : i32
    return %c0_i32, %c0_i32_0 : i32, i32
  }
  func.func @transform_9(%arg0: i32, %arg1: i32) -> (i32, i32) {
    %c0_i32 = arith.constant 0 : i32
    %c0_i32_0 = arith.constant 0 : i32
    %c0_i32_1 = arith.constant 0 : i32
    return %c0_i32, %c0_i32_0 : i32, i32
  }
  func.func @transform_10(%arg0: i32, %arg1: i32) -> (i32, i32) {
    %c0_i32 = arith.constant 0 : i32
    %c0_i32_0 = arith.constant 0 : i32
    %c0_i32_1 = arith.constant 0 : i32
    return %c0_i32, %c0_i32_0 : i32, i32
  }
  func.func @transform_11(%arg0: i32, %arg1: i32) -> (i32, i32) {
    %c0_i32 = arith.constant 0 : i32
    %c0_i32_0 = arith.constant 0 : i32
    %c0_i32_1 = arith.constant 0 : i32
    return %c0_i32, %c0_i32_0 : i32, i32
  }
  func.func @transform_12(%arg0: i32, %arg1: i32) -> (i32, i32) {
    %c0_i32 = arith.constant 0 : i32
    %c0_i32_0 = arith.constant 0 : i32
    %c0_i32_1 = arith.constant 0 : i32
    return %c0_i32, %c0_i32_0 : i32, i32
  }
  func.func @transform_13(%arg0: i32, %arg1: i32) -> (i32, i32) {
    %c0_i32 = arith.constant 0 : i32
    %c0_i32_0 = arith.constant 0 : i32
    %c0_i32_1 = arith.constant 0 : i32
    return %c0_i32, %c0_i32_0 : i32, i32
  }
  func.func @transform_14(%arg0: i32, %arg1: i32) -> (i32, i32) {
    %c0_i32 = arith.constant 0 : i32
    %c0_i32_0 = arith.constant 0 : i32
    %c0_i32_1 = arith.constant 0 : i32
    return %c0_i32, %c0_i32_0 : i32, i32
  }
  func.func @transform_15(%arg0: i32, %arg1: i32) -> (i32, i32) {
    %c0_i32 = arith.constant 0 : i32
    %c0_i32_0 = arith.constant 0 : i32
    %c0_i32_1 = arith.constant 0 : i32
    return %c0_i32, %c0_i32_0 : i32, i32
  }
  func.func @transform_16(%arg0: i32, %arg1: i32) -> (i32, i32) {
    %c0_i32 = arith.constant 0 : i32
    %c0_i32_0 = arith.constant 0 : i32
    %c0_i32_1 = arith.constant 0 : i32
    return %c0_i32, %c0_i32_0 : i32, i32
  }
  func.func @transform_17(%arg0: i32, %arg1: i32) -> (i32, i32) {
    %c0_i32 = arith.constant 0 : i32
    %c0_i32_0 = arith.constant 0 : i32
    %c0_i32_1 = arith.constant 0 : i32
    return %c0_i32, %c0_i32_0 : i32, i32
  }
  func.func @transform_18(%arg0: i32, %arg1: i32) -> (i32, i32, i32) {
    %c0_i32 = arith.constant 0 : i32
    %c0_i32_0 = arith.constant 0 : i32
    return %arg0, %arg1, %c0_i32 : i32, i32, i32
  }
}

</mosaic_0001>

<bundles_post_ra>
// kernel: tpu_custom_call.1
= control target key start
LH: loop header
LB: loop body
LE: loop exit
PB: predicated region body
PF: predicated region fallthrough
CT: control target
= control target key end

     0   :  { %s4419_s0 = inlined_call_operand.vmem [shape: f32[2,16,32], index: 0, kind: input, shape index: {}]   ;;  %s4420_s1 = inlined_call_operand.hbm [shape: f32[2,16,16], index: 1, kind: input, shape index: {}]   ;;  %s4421_s2 = inlined_call_operand.vmem [shape: bf16[32,32], index: 2, kind: input, shape index: {}]   ;;  %s4422_s3 = inlined_call_operand.hbm [shape: f32[1,32], index: 3, kind: input, shape index: {}]   ;;  %s4423_s4 = inlined_call_operand.hbm [shape: bf16[32,32], index: 4, kind: input, shape index: {}]   ;;  %s4424_s5 = inlined_call_operand.hbm [shape: f32[1,32], index: 5, kind: input, shape index: {}]   ;;  %s4425_s6 = inlined_call_operand.hbm [shape: bf16[32,32], index: 6, kind: input, shape index: {}]   ;;  %s4426_s7 = inlined_call_operand.hbm [shape: f32[1,32], index: 7, kind: input, shape index: {}]   ;;  %s4427_s8 = inlined_call_operand.hbm [shape: bf16[32,32], index: 8, kind: input, shape index: {}]   ;;  %s4428_s9 = inlined_call_operand.hbm [shape: f32[1,32], index: 9, kind: input, shape index: {}]   ;;  %s4429_s10 = inlined_call_operand.vmem [shape: bf16[32,64], index: 10, kind: input, shape index: {}]   ;;  %s4430_s11 = inlined_call_operand.vmem [shape: f32[1,64], index: 11, kind: input, shape index: {}]   ;;  %s4431_s12 = inlined_call_operand.vmem [shape: bf16[64,32], index: 12, kind: input, shape index: {}]   ;;  %s4432_s13 = inlined_call_operand.vmem [shape: f32[1,32], index: 13, kind: input, shape index: {}]   ;;  %s4433_s14 = inlined_call_operand.vmem [shape: f32[1,32], index: 14, kind: input, shape index: {}]   ;;  %s4434_s15 = inlined_call_operand.vmem [shape: f32[1,32], index: 15, kind: input, shape index: {}]   ;;  %s4435_s16 = inlined_call_operand.vmem [shape: f32[1,32], index: 16, kind: input, shape index: {}]   ;;  %s4436_s17 = inlined_call_operand.vmem [shape: f32[1,32], index: 17, kind: input, shape index: {}]   ;;  %s4437_s18 = inlined_call_operand.hbm [shape: f32[2,16,32], index: 18, kind: output, shape index: {}]  }
   0x1   :  { %4451 = sst [smem:[#allocation30_spill]] %s4419_s0 }
   0x2   :  { %4452 = sst [smem:[#allocation31_spill]] %s4420_s1 }
   0x3   :  { %4453 = sst [smem:[#allocation32_spill]] %s4421_s2 }
   0x4   :  { %4454 = sst [smem:[#allocation33_spill]] %s4422_s3 }
   0x5   :  { %4455 = sst [smem:[#allocation34_spill]] %s4423_s4 }
   0x6   :  { %4456 = sst [smem:[#allocation35_spill]] %s4424_s5 }
   0x7   :  { %4457 = sst [smem:[#allocation36_spill]] %s4425_s6 }
   0x8   :  { %4458 = sst [smem:[#allocation37_spill]] %s4426_s7 }
   0x9   :  { %4459 = sst [smem:[#allocation38_spill]] %s4427_s8 }
   0xa   :  { %4460 = sst [smem:[#allocation39_spill]] %s4428_s9 }
   0xb   :  { %4461 = sst [smem:[#allocation40_spill]] %s4430_s11 }
   0xc   :  { %4462 = sst [smem:[#allocation41_spill]] %s4431_s12 }
   0xd   :  { %4463 = sst [smem:[#allocation42_spill]] %s4432_s13 }
   0xe   :  { %4464 = sst [smem:[#allocation43_spill]] %s4435_s16 }
   0xf   :  { %4465 = sst [smem:[#allocation44_spill]] %s4436_s17 }
  0x10   :  { %4466 = sst [smem:[#allocation45_spill]] %s4437_s18 }
  0x11   :  { %23 = vsyncpa [#allocation5], 0 }
  0x12   :  { %25 = vsyncpa [#allocation5 + $0x1], 0 }
  0x13   :  { %26 = vsyncpa [#allocation8], 0 }
  0x14   :  { %27 = vsyncpa [#allocation11], 0 }
  0x15   :  { %28 = vsyncpa [#allocation14], 0 }
  0x16   :  { %29 = vsyncpa [#allocation17], 0 }
  0x17   :  { %30 = vsyncpa [#allocation6], 0 }
  0x18   :  { %32 = vsyncpa [#allocation6 + $0x1], 0  ;;  %s3846_s27 = smov 0   ;;  %s3848_s28 = smov 0  }
  0x19   :  { %s3850_s29 = smov 0   ;;  %s3852_s30 = smov 0  }
  0x1a   :  { %s3854_s0 = smov 0   ;;  %s3856_s19 = smov 0  }
  0x1b   :  { %s3858_s1 = smov 0   ;;  %s3860_s20 = smov 0  }
  0x1c LB: > { %4467 = sst [smem:[#allocation25_spill]] %s3693_s27  ;;  %s4439_s21 = sadd.s32 4294967295, %s3721_s20   ;;  %s3721_s20 = sphi %s3860_s20, %s38_s20   ;;  %s3717_s1 = sphi %s3858_s1, %s4512_s1   ;;  %s3713_s19 = sphi %s3856_s19, %s4511_s19   ;;  %s3709_s0 = sphi %s3854_s0, %s4510_s0   ;;  %s3705_s30 = sphi %s3852_s30, %s4509_s30   ;;  %s3701_s29 = sphi %s3850_s29, %s4508_s29   ;;  %s3697_s28 = sphi %s3848_s28, %s4507_s28   ;;  %s3693_s27 = sphi %s3846_s27, %s4506_s27  }
  0x1d   : > { %p2916_p0 = scmp.ge.s32.totalorder %s3721_s20, 1  ;;  %p3890_p1 = scmp.eq.s32.totalorder %s4439_s21, 0 }
  0x1e   : > { %p473_p2 = scmp.lt.s32.totalorder %s3721_s20, 5  ;;  %s3723_s23 = smov [#allocation7]  }
  0x1f   : > { %s4468_s22 = scalar_select %p3890_p1, 1, 0 }
  0x20   : > { %p3895_p3 = pnand %p2916_p0, %p473_p2  ;;  %s489_s24 = sshll.u32 %s3723_s23, 4  ;;  %s490_s24 = int_to_ptr.vmem [resolvable:$true] %s489_s24 }
  0x21   : > { %s3724_s25 = smov [#allocation10]   ;;  %s3725_s18 = smov [#allocation13]  }
  0x22   : > { %s4469_s2 = scalar_select %p3895_p3, 1, 0 }
  0x23   : > { %p3209_p4 = pneg %p3895_p3  ;;  %s513_s26 = sshll.u32 %s3724_s25, 4  ;;  %s514_s26 = int_to_ptr.vmem [resolvable:$true] %s513_s26 }
  0x24   : > { %s537_s13 = sshll.u32 %s3725_s18, 4  ;;  %s3410_s23 = scalar_lea.vmem %s490_s24, 16  ;;  %s3907_s13 = int_to_ptr.vmem [resolvable:$true] %s537_s13 }
  0x25   : > { %p3903_p5 = pnand %p3209_p4, %p3890_p1  ;;  %p3411_p7 = scmp.ne.s32.totalorder %s490_s24, %s3410_s23 }
  0x26   : > { %s3417_s25 = scalar_lea.vmem %s490_s24, 32  ;;  %p3418_p10 = scmp.lt.s32.totalorder %s490_s24, %s490_s24 }
  0x27   : > { %p3911_p6 = pneg %p3903_p5  ;;  %p3419_p11 = scmp.lt.s32.totalorder %s3417_s25, %s3410_s23 }
  0x29   : > { %p3413_p8 = pnand %p3411_p7, %p3911_p6  ;;  %p3420_p12 = por %p3419_p11, %p3418_p10 }
  0x2b   : > { %p3414_p9 = pneg %p3413_p8 }
  0x2d   : > { %p3421_p13 = pnand %p3420_p12, %p3414_p9 }
  0x2f   : > { %3424 = shalt.err (!%p3421_p13)
}
  0x30   : > { %s4472_s3 = sld [smem:[#allocation33_spill]]  ;;  %s3436_s16 = scalar_lea.vmem %s514_s26, 16 }
  0x31   : > { %p3437_p0 = scmp.ne.s32.totalorder %s514_s26, %s3436_s16  ;;  %s3443_s12 = scalar_lea.vmem %s514_s26, 32 }
  0x32   : > { %p3444_p7 = scmp.lt.s32.totalorder %s514_s26, %s514_s26  ;;  %p3445_p8 = scmp.lt.s32.totalorder %s3443_s12, %s3436_s16 }
  0x33   : > { %p3439_p2 = pnand %p3437_p0, %p3911_p6 }
  0x34   : > { %p3446_p3 = por %p3445_p8, %p3444_p7 }
  0x35   : > { %p3440_p4 = pneg %p3439_p2 }
  0x36   : > { %3212 = dma.hbm_to_vmem [thread:$0]  (!%p3903_p5), %s4472_s3, 16, %s490_s24, [#allocation8]  }
  0x37   : > { %p3447_p1 = pnand %p3446_p3, %p3440_p4 }
  0x39   : > { %3450 = shalt.err (!%p3447_p1)
}
  0x3a   : > { %s4473_s5 = sld [smem:[#allocation35_spill]]  ;;  %s3462_s17 = scalar_lea.vmem %s3907_s13, 16 }
  0x3b   : > { %p3463_p9 = scmp.ne.s32.totalorder %s3907_s13, %s3462_s17  ;;  %s3469_s12 = scalar_lea.vmem %s3907_s13, 32 }
  0x3c   : > { %p3470_p3 = scmp.lt.s32.totalorder %s3907_s13, %s3907_s13  ;;  %p3471_p1 = scmp.lt.s32.totalorder %s3469_s12, %s3462_s17 }
  0x3d   : > { %p3465_p10 = pnand %p3463_p9, %p3911_p6 }
  0x3e   : > { %p3472_p12 = por %p3471_p1, %p3470_p3 }
  0x3f   : > { %p3466_p11 = pneg %p3465_p10 }
  0x40   : > { %3218 = dma.hbm_to_vmem [thread:$0]  (!%p3903_p5), %s4473_s5, 16, %s514_s26, [#allocation11]  }
  0x41   : > { %p3473_p13 = pnand %p3472_p12, %p3466_p11 }
  0x43   : > { %3476 = shalt.err (!%p3473_p13)
}
  0x44   : > { %s4474_s7 = sld [smem:[#allocation37_spill]]  ;;  %s3726_s26 = smov [#allocation9]  }
  0x45   : > { %s499_s18 = sshll.u32 %s3726_s26, 4  ;;  %s500_s18 = int_to_ptr.vmem [resolvable:$true] %s499_s18 }
  0x46   : > { %s3488_s23 = scalar_lea.vmem %s500_s18, 256  ;;  %p3496_p7 = scmp.lt.s32.totalorder %s500_s18, %s500_s18 }
  0x47   : > { %p3489_p0 = scmp.ne.s32.totalorder %s500_s18, %s3488_s23  ;;  %p3497_p8 = scmp.lt.s32.totalorder %s3488_s23, %s3488_s23 }
  0x49   : > { %p3491_p2 = pnand %p3489_p0, %p3911_p6  ;;  %p3498_p9 = por %p3497_p8, %p3496_p7 }
  0x4a   : > { %3224 = dma.hbm_to_vmem [thread:$0]  (!%p3903_p5), %s4474_s7, 16, %s3907_s13, [#allocation14]  }
  0x4b   : > { %p3492_p4 = pneg %p3491_p2 }
  0x4d   : > { %p3499_p10 = pnand %p3498_p9, %p3492_p4 }
  0x4f   : > { %3502 = shalt.err (!%p3499_p10)
}
  0x50   : > { %s3727_s25 = smov 64   ;;  %s3728_s17 = smov 4  }
  0x51   : > { %s4475_s4 = sld [smem:[#allocation34_spill]]  ;;  %s3729_s16 = smov [#allocation12]  }
  0x52   : > { %s523_s24 = sshll.u32 %s3729_s16, 4  ;;  %s3730_s26 = smov [#allocation15]   ;;  %s524_s24 = int_to_ptr.vmem [resolvable:$true] %s523_s24 }
  0x53   : > { %s547_s3 = sshll.u32 %s3730_s26, 4  ;;  %s3514_s23 = scalar_lea.vmem %s524_s24, 256  ;;  %s548_s3 = int_to_ptr.vmem [resolvable:$true] %s547_s3 }
  0x54   : > { %p3515_p11 = scmp.ne.s32.totalorder %s524_s24, %s3514_s23  ;;  %p3522_p12 = scmp.lt.s32.totalorder %s524_s24, %s524_s24 }
  0x55   : > { %p3523_p13 = scmp.lt.s32.totalorder %s3514_s23, %s3514_s23 }
  0x56   : > { %p3517_p3 = pnand %p3515_p11, %p3911_p6 }
  0x57   : > { %3215 = dma.hbm_to_vmem [thread:$0]  (!%p3903_p5), %s4475_s4, 256, %s500_s18, [#allocation8], %s3727_s25, %s3727_s25, %s3728_s17  }
  0x58   : > { %p3518_p1 = pneg %p3517_p3  ;;  %p3524_p0 = por %p3523_p13, %p3522_p12 }
  0x5a   : > { %p3525_p2 = pnand %p3524_p0, %p3518_p1 }
  0x5c   : > { %3528 = shalt.err (!%p3525_p2)
}
  0x5d   : > { %s4476_s6 = sld [smem:[#allocation36_spill]]  ;;  %s3540_s12 = scalar_lea.vmem %s548_s3, 256 }
  0x5e   : > { %p3541_p4 = scmp.ne.s32.totalorder %s548_s3, %s3540_s12  ;;  %p3548_p9 = scmp.lt.s32.totalorder %s548_s3, %s548_s3 }
  0x5f   : > { %p3549_p10 = scmp.lt.s32.totalorder %s3540_s12, %s3540_s12 }
  0x60   : > { %p3543_p7 = pnand %p3541_p4, %p3911_p6 }
  0x61   : > { %p3550_p11 = por %p3549_p10, %p3548_p9 }
  0x62   : > { %p3544_p8 = pneg %p3543_p7 }
  0x63   : > { %3221 = dma.hbm_to_vmem [thread:$0]  (!%p3903_p5), %s4476_s6, 256, %s524_s24, [#allocation11], %s3727_s25, %s3727_s25, %s3728_s17  }
  0x64   : > { %p3551_p3 = pnand %p3550_p11, %p3544_p8 }
  0x66   : > { %3554 = shalt.err (!%p3551_p3)
}
  0x67   : > { %s4477_s8 = sld [smem:[#allocation38_spill]]  ;;  %s3731_s24 = smov [#allocation16]  }
  0x68   : > { %s561_s23 = sshll.u32 %s3731_s24, 4  ;;  %s562_s23 = int_to_ptr.vmem [resolvable:$true] %s561_s23 }
  0x69   : > { %s3566_s18 = scalar_lea.vmem %s562_s23, 16  ;;  %s3573_s13 = scalar_lea.vmem %s562_s23, 32 }
  0x6a   : > { %p3567_p1 = scmp.ne.s32.totalorder %s562_s23, %s3566_s18  ;;  %p3574_p0 = scmp.lt.s32.totalorder %s562_s23, %s562_s23 }
  0x6b   : > { %p3575_p2 = scmp.lt.s32.totalorder %s3573_s13, %s3566_s18 }
  0x6c   : > { %p3569_p12 = pnand %p3567_p1, %p3911_p6 }
  0x6d   : > { %3227 = dma.hbm_to_vmem [thread:$0]  (!%p3903_p5), %s4477_s8, 256, %s548_s3, [#allocation14], %s3727_s25, %s3727_s25, %s3728_s17  }
  0x6e   : > { %p3570_p13 = pneg %p3569_p12  ;;  %p3576_p4 = por %p3575_p2, %p3574_p0 }
  0x70   : > { %p3577_p7 = pnand %p3576_p4, %p3570_p13 }
  0x72   : > { %3580 = shalt.err (!%p3577_p7)
}
  0x73   : > { %s4478_s9 = sld [smem:[#allocation39_spill]]  ;;  %s2915_s3 = sadd.s32 4294967294, %s3721_s20  }
  0x74   : > { %s47_s11 = sadd.s32 1, %s3713_s19  ;;  %s50_s21 = sadd.s32 1, %s3717_s1 }
  0x75   : > { %p48_p6 = scmp.ge.s32.totalorder %s47_s11, 2  ;;  %s85_s25 = sadd.s32 1, %s3701_s29 }
  0x76   : > { %p92_p8 = scmp.ne.s32.totalorder %s3701_s29, %s3697_s28  ;;  %p93_p9 = scmp.eq.s32.totalorder %s3721_s20, 0 }
  0x77   : > { %s4514_s11 = smov (%p48_p6, %s47_s11), 0  ;;  %s4516_s21 = smov (!%p48_p6, %s50_s21), %s3717_s1 }
  0x78   : > { %4479 = sst [smem:[#allocation26_spill]] %s4514_s11  ;;  %s81_s17 = ssub.s32 %s3713_s19, %s4514_s11 }
  0x79   : > { %3230 = dma.hbm_to_vmem [thread:$0]  (!%p3903_p5), %s4478_s9, 16, %s562_s23, [#allocation17]  }
  0x7a   : > { %p3991_p10 = por %p93_p9, %p92_p8  ;;  %p52_p5 = scmp.ge.s32.totalorder %s4516_s21, 2 }
  0x7b   : > { %p98_p11 = scmp.ne.s32.totalorder %s3697_s28, %s3693_s27  ;;  %s4481_s24 = sadd.s32 4294967295, %s3721_s20  }
  0x7c   : > { %p460_p3 = scmp.eq.s32.totalorder %s4481_s24, 3  ;;  %p466_p1 = scmp.eq.s32.totalorder %s2915_s3, 3 }
  0x7d   : > { %s4518_s21 = smov (%p52_p5, %s4516_s21), 0  ;;  %p4483_p12 = scmp.ne.s32.totalorder %s4468_s22, 0 }
  0x7e   : > { %4482 = sst [smem:[#allocation27_spill]] %s4518_s21  ;;  %p4007_p0 = por %p460_p3, %p92_p8 }
  0x7f   : > { %p4003_p13 = por %p4483_p12, %p98_p11  ;;  %s80_s13 = ssub.s32 %s3717_s1, %s4518_s21 }
  0x80   : > { %s4485_s18 = scalar_select %p4007_p0, 1, 0 }
  0x81   : > { %p4013_p2 = por %p466_p1, %p98_p11  ;;  %s82_s16 = sor.u32 %s81_s17, %s80_s13 }
  0x82   : > { %4486 = sst [smem:[#allocation28_spill]] %s4485_s18  ;;  %p3246_p4 = scmp.lt.s32.totalorder %s3721_s20, 4 }
  0x83   : > { %s4487_s12 = scalar_select %p4013_p2, 1, 0 }
  0x84   : > { %p83_p7 = scmp.eq.s32.totalorder %s82_s16, 0  ;;  %s604_s3 = sand.u32 1, %s3701_s29  }
  0x85   : > { %4488 = sst [smem:[#allocation29_spill]] %s4487_s12  ;;  %s2925_s24 = sshll.u32 %s604_s3, 3 }
  0x86   : > { %s4020_s4 = scalar_select %p83_p7, %s3701_s29, %s85_s25  }
  0x87   : > { %s2926_s5 = sshll.u32 %s3717_s1, 1  ;;  %s608_s7 = scalar_lea.vmem [#allocation4], %s2925_s24 }
  0x88   : > { %s613_s6 = sadd.s32 %s3713_s19, %s2926_s5  ;;  %s617_s8 = sshll.u32 %s608_s7, 4  ;;  %s618_s8 = int_to_ptr.vmem [resolvable:$true] %s617_s8 }
  0x89   : > { %s2927_s9 = sshll.u32 %s613_s6, 7  ;;  %s4489_s21 = sld [smem:[#allocation31_spill]] }
  0x8a   : > { %p4029_p6 = pnand %p3246_p4, %p3991_p10  ;;  %s605_s17 = scalar_lea.sflag [#allocation5], %s604_s3 }
  0x8b   : > { %s3594_s25 = scalar_lea.vmem %s618_s8, 128  ;;  %s3732_s5 = smov [#allocation4]  }
  0x8c   : > { %p3583_p8 = pneg %p4029_p6  ;;  %p3595_p9 = scmp.ne.s32.totalorder %s618_s8, %s3594_s25 }
  0x8d   : > { %s3599_s6 = sshll.u32 %s3732_s5, 4  ;;  %s3600_s6 = int_to_ptr.vmem [resolvable:$false] %s3599_s6 }
  0x8e   : > { %p3597_p5 = pnand %p3595_p9, %p3583_p8  ;;  %s3601_s7 = scalar_lea.vmem %s3600_s6, 256 }
  0x8f   : > { %s615_s18 = scalar_lea.hbm %s4489_s21, %s2927_s9  ;;  %p3602_p3 = scmp.lt.s32.totalorder %s618_s8, %s3600_s6 }
  0x90   : > { %p3598_p11 = pneg %p3597_p5  ;;  %p3603_p1 = scmp.lt.s32.totalorder %s3601_s7, %s3594_s25 }
  0x92   : > { %p3604_p12 = por %p3603_p1, %p3602_p3 }
  0x94   : > { %p3605_p7 = pnand %p3604_p12, %p3598_p11 }
  0x96   : > { %3608 = shalt.err (!%p3605_p7)
}
  0x97   : > { %3234 = dma.hbm_to_vmem [thread:$0]  (!%p4029_p6), %s615_s18, 128, %s618_s8, %s605_s17  }
  0x98   : > { %p4491_p10 = scmp.ne.s32.totalorder %s4469_s2, 0 }
  0x99   : > { %s4040_s9 = sand.u32 (!%p4491_p10), 1, %s3697_s28  }
  0x9a   : > { %626 = sbr.rel (%p4491_p10) target bundleno = 3326 (0xcfe), region = 92  ;;  %s2929_s27 = sshll.u32 (!%p4491_p10), %s4040_s9, 3 }
  0x9b   : > { %s629_s11 = scalar_lea.sflag (!%p4491_p10), [#allocation5], %s4040_s9  ;;  %s4044_s21 = scalar_lea.vmem (!%p4491_p10), [#allocation4], %s2929_s27 }
  0x9f   : > { %3668 = dma.done.wait (%p4003_p13), %s629_s11, 128  }
  0xa0   : > { %3670 = vsyncadd (%p4003_p13), %s629_s11, 4294967168  ;;  %p4492_p4 = scmp.ne.s32.totalorder %s4468_s22, 0 }
  0xa2   : > { %3672 = dma.done.wait (%p4492_p4), [#allocation8], 272  }
  0xa3   : > { %3674 = vsyncadd (%p4492_p4), [#allocation8], 4294967024 }
  0xa4   : > { %3676 = dma.done.wait (%p4492_p4), [#allocation11], 272  }
  0xa5   : > { %3678 = vsyncadd (%p4492_p4), [#allocation11], 4294967024 }
  0xa6   : > { %3680 = dma.done.wait (%p4492_p4), [#allocation14], 272  }
  0xa7   : > { %3682 = vsyncadd (%p4492_p4), [#allocation14], 4294967024 }
  0xa8   : > { %3684 = dma.done.wait (%p4492_p4), [#allocation17], 16  }
  0xa9   : > { %3686 = vsyncadd (%p4492_p4), [#allocation17], 4294967280  ;;  %p718_p13 = scmp.lt.s32.totalorder %s3709_s0, 1  ;;  %s4493_s18 = sld [smem:[#allocation30_spill]] }
  0xaa   : > { %s4073_s12 = scalar_lea.vmem [#allocation18], %s2929_s27  ;;  %p2940_p6 = scmp.ne.s32.totalorder %s3705_s30, 0 }
  0xab   : > { %s719_s8 = scalar_select %p718_p13, %s3709_s0, 1 }
  0xac   : > { %727 = sbr.rel (%p2940_p6) target bundleno = 874 (0x36a), region = 128  ;;  %s3735_s17 = smov (!%p2940_p6), 112  }
  0xad   : > { %s3024_s2 = sshll.u32 %s719_s8, 4  ;;  %s3736_s25 = smov (!%p2940_p6), 120  }
  0xae   : > { %s3737_s5 = smov (!%p2940_p6), 104  }
  0xaf   : > { %s4071_s13 = scalar_lea.vmem %s4493_s18, %s3024_s2 }
  0xb1   : > { %v728_v0 = vld [vmem:[%s4071_s13] sm:$0xff]  ;;  %vm732_vm0 = vcmask 261120   ;;  %v729_v1 = vld [vmem:[%s4071_s13 + $0x8] sm:$0xff]  ;;  %v3733_v16 = vmov 0.0   ;;  %v3347_v17 = vld [vmem:[#allocation9] sm:$0xff]   ;;  %vm3734_vm1 = vmmov 0   ;;  %v947_v62 = vlaneseq }
  0xb2   : > { %v733_v2 = vsel %vm732_vm0, %v728_v0, 0.0  ;;  %v736_v3 = vsel %vm732_vm0, %v729_v1, 0.0  ;;  %v3345_v14 = vld [vmem:[#allocation9 + $0x8] sm:$0xff]   ;;  %v3346_v15 = vld [vmem:[#allocation12 + $0x8] sm:$0xff]   ;;  %3077 = vmatprep.subr.bf16.mxu0 %v3733_v16  ;;  %3085 = vmatprep.subr.bf16.mxu1 %v3733_v16  ;;  %v3348_v18 = vld [vmem:[#allocation12] sm:$0xff]   ;;  %vm1246_vm6 = vcmask 60416  }
  0xb3   : > { %734 = vadd.xlane.f32.xlu0 %v733_v2  ;;  %3078 = vmatpush3.bf16.msra.mxu0 %v3345_v14  ;;  %v2941_v35 = vld [vmem:[%s4433_s14] ss:$0 sm:$0xff]  ;;  %v2943_v46 = vld [vmem:[#allocation10] ss:$0 sm:$0xff]  ;;  %v2947_v55 = vld [vmem:[#allocation13] ss:$0 sm:$0xff] }
  0xb4   : > { %3086 = vmatpush3.bf16.msra.mxu1 %v3346_v15  ;;  %3079 = vmatprep.subr.bf16.mxu0 %v3733_v16  ;;  %v2942_v41 = vld [vmem:[%s4434_s15] ss:$0 sm:$0xff]  ;;  %v3738_v60 = vmov 1983009808   ;;  %v3739_v63 = vmov 1934713408  }
  0xb5   : > { %3087 = vmatprep.subr.bf16.mxu1 %v3733_v16  ;;  %3081 = vmatprep.mubr.msk.bf16.mxu0 %vm3734_vm1, %v3733_v16  ;;  %v945_v61 = vunpack.c.l.s4 %v3738_v60  ;;  %v948_v2 = vshrl.u32 %v947_v62, 7 }
  0xb6   : > { %3089 = vmatprep.mubr.msk.bf16.mxu1 %vm3734_vm1, %v3733_v16 }
  0xb7   : > { %737 = vadd.xlane.f32.xlu0 %v736_v3  ;;  %3080 = vmatpush3.bf16.msra.mxu0 %v3347_v17 }
  0xb8   : > { %3088 = vmatpush3.bf16.msra.mxu1 %v3348_v18 }
 0x13c   : > { %v735_v4 = vpop.xlane.xlu0 %734 }
 0x13d   : > { %v740_v5 = vmul.f32 0.03125, %v735_v4 }
 0x13f   : > { %v742_v6 = vsub.f32 %v728_v0, %v740_v5  ;;  %v977_v0 = vunpack.c.l.s4 %v3739_v63 }
 0x140   : > { %v738_v7 = vpop.xlane.xlu0 %737 }
 0x141   : > { %v741_v8 = vmul.f32 0.03125, %v738_v7  ;;  %v744_v9 = vmul.f32 %v742_v6, %v742_v6  ;;  %v778_v37 = vmul.f32 %v2941_v35, %v742_v6  ;;  %v978_v5 = vunpack.c.0.s8 %v977_v0 }
 0x143   : > { %v743_v10 = vsub.f32 %v729_v1, %v741_v8  ;;  %v746_v11 = vsel %vm732_vm0, %v744_v9, 0.0  ;;  %v946_v1 = vunpack.c.0.s8 %v945_v61 }
 0x144   : > { %747 = vadd.xlane.f32.xlu1 %v746_v11 }
 0x145   : > { %v745_v12 = vmul.f32 %v743_v10, %v743_v10  ;;  %v779_v38 = vmul.f32 %v2941_v35, %v743_v10  ;;  %v4100_v6 = vsub.s32 %v946_v1, %v948_v2 }
 0x147   : > { %v749_v13 = vsel %vm732_vm0, %v745_v12, 0.0 }
 0x148   : > { %750 = vadd.xlane.f32.xlu1 %v749_v13  ;;  %v4102_v13 = vsub.s32 %v978_v5, %v948_v2 }
 0x1cd   : > { %v748_v19 = vpop.xlane.xlu1 %747 }
 0x1ce   : > { %v752_v20 = vmul.f32 0.032258064, %v748_v19 }
 0x1d0   : > { %3349 = vrsqrt.f32 %v752_v20  ;;  %vm756_vm2 = vcmp.eq.f32.partialorder %v752_v20, inf  ;;  %v759_v25 = vand.u32 2147483648, %v752_v20  ;;  %vm758_vm3 = vcmp.eq.f32.partialorder %v752_v20, 0.0 }
 0x1d1   : > { %v751_v21 = vpop.xlane.xlu1 %750 }
 0x1d2   : > { %v753_v22 = vmul.f32 0.032258064, %v751_v21 }
 0x1d4   : > { %3351 = vrsqrt.f32 %v753_v22  ;;  %vm763_vm4 = vcmp.eq.f32.partialorder %v753_v22, inf  ;;  %v766_v31 = vand.u32 2147483648, %v753_v22  ;;  %vm765_vm5 = vcmp.eq.f32.partialorder %v753_v22, 0.0 }
 0x1dd   : > { %v3350_v23 = vpop.eup %3349 }
 0x1de   : > { %v755_v24 = vmul.f32 %v3350_v23, %v752_v20 }
 0x1e0   : > { %v757_v26 = vsel %vm756_vm2, %v752_v20, %v755_v24 }
 0x1e1   : > { %v3352_v27 = vpop.eup %3351  ;;  %v760_v28 = vsel %vm758_vm3, %v759_v25, %v757_v26 }
 0x1e2   : > { %v768_v29 = vadd.f32 1e-06, %v760_v28  ;;  %v762_v30 = vmul.f32 %v3352_v27, %v753_v22 }
 0x1e4   : > { %3353 = vrcp.f32 %v768_v29  ;;  %v764_v32 = vsel %vm763_vm4, %v753_v22, %v762_v30 }
 0x1e5   : > { %v767_v33 = vsel %vm765_vm5, %v766_v31, %v764_v32 }
 0x1e6   : > { %v769_v34 = vadd.f32 1e-06, %v767_v33 }
 0x1e8   : > { %3355 = vrcp.f32 %v769_v34 }
 0x1f1   : > { %v3354_v36 = vpop.eup %3353 }
 0x1f2   : > { %v780_v39 = vmul.f32 %v3354_v36, %v778_v37 }
 0x1f4   : > { %v788_v43 = vadd.f32 %v2942_v41, %v780_v39 }
 0x1f5   : > { %v3356_v40 = vpop.eup %3355 }
 0x1f6   : > { %v781_v42 = vmul.f32 %v3356_v40, %v779_v38 }
 0x1f8   : > { %v789_v44 = vadd.f32 %v2942_v41, %v781_v42 }
 0x1fa   : > { %v790_v45 = vpack.c.bf16 %v789_v44, %v788_v43 }
 0x1fc   : > { %3082 = vmatmul.mubr.msk.bf16.vlgmr.msra.gmra.mxu0 %vm732_vm0, %v790_v45  ;;  %3090 = vmatmul.mubr.msk.bf16.vlgmr.msra.gmra.mxu1 %vm732_vm0, %v790_v45 }
 0x2bc   : > { %v851_v47 = vpop.f32.mrf.mxu0  ;;  %v915_v48 = vpop.f32.mrf.mxu1 }
 0x2bd   : > { %v852_v49 = vadd.f32 %v2943_v46, %v851_v47  ;;  %v4090_v58 = vadd.f32 %v2947_v55, %v915_v48 }
 0x2be   : > { %v3083_v50 = vpop.f32.mrf.mxu0  ;;  %v3091_v51 = vpop.f32.mrf.mxu1 }
 0x2bf   : > { %930 = vrot.lane.b32.xlu1 %v852_v49, %s3735_s17  ;;  %924 = vrot.lane.b32.xlu0 %v852_v49, %s3736_s25 }
 0x2c0   : > { %v854_v52 = vpop.f32.mrf.mxu0  ;;  %v918_v53 = vpop.f32.mrf.mxu1 }
 0x2c1   : > { %v855_v54 = vadd.f32 %v2943_v46, %v854_v52  ;;  %v4094_v59 = vadd.f32 %v2947_v55, %v918_v53 }
 0x2c2   : > { %v3084_v56 = vpop.f32.mrf.mxu0  ;;  %v3092_v57 = vpop.f32.mrf.mxu1 }
 0x2c3   : > { %936 = vrot.lane.b32.xlu0 %v852_v49, %s3737_s5  ;;  %926 = vrot.lane.b32.xlu1 %v855_v54, %s3736_s25 }
 0x2c7   : > { %1257 = vrot.lane.b32.xlu0 %v4090_v58, %s3736_s25  ;;  %932 = vrot.lane.b32.xlu1 %v855_v54, %s3735_s17 }
 0x2cb   : > { %1263 = vrot.lane.b32.xlu0 %v4090_v58, %s3735_s17  ;;  %938 = vrot.lane.b32.xlu1 %v855_v54, %s3737_s5 }
 0x2cf   : > { %1269 = vrot.lane.b32.xlu0 %v4090_v58, %s3737_s5  ;;  %1259 = vrot.lane.b32.xlu1 %v4094_v59, %s3736_s25 }
 0x2d3   : > { %1265 = vrot.lane.b32.xlu1 %v4094_v59, %s3735_s17 }
 0x2d7   : > { %1271 = vrot.lane.b32.xlu1 %v4094_v59, %s3737_s5 }
 0x331   : > { %v931_v3 = vpop.permute.xlu1 %930  ;;  %v925_v4 = vpop.permute.xlu0 %924 }
 0x332   : > { %v942_v7 = vcombine.low %v852_v49, %v931_v3  ;;  %v943_v8 = vcombine.high %v852_v49, %v931_v3 }
 0x334   : > { %v950_v14 = vrot.slane %v942_v7, %v4100_v6  ;;  %v957_v15 = vrot.slane %v943_v8, %v4100_v6 }
 0x335   : > { %v937_v9 = vpop.permute.xlu0 %936  ;;  %v927_v10 = vpop.permute.xlu1 %926 }
 0x336   : > { %v958_v11 = vcombine.low %v925_v4, %v937_v9  ;;  %v959_v12 = vcombine.high %v925_v4, %v937_v9 }
 0x338   : > { %v966_v16 = vrot.slane %v958_v11, %v4100_v6  ;;  %v973_v17 = vrot.slane %v959_v12, %v4100_v6 }
 0x339   : > { %v4108_v18 = vpop.permute.xlu0 %1257  ;;  %v933_v19 = vpop.permute.xlu1 %932 }
 0x33a   : > { %v974_v20 = vcombine.low %v950_v14, %v966_v16  ;;  %v975_v21 = vcombine.high %v950_v14, %v966_v16  ;;  %v990_v22 = vcombine.low %v957_v15, %v973_v17  ;;  %v991_v23 = vcombine.high %v957_v15, %v973_v17 }
 0x33b   : > { %v1010_v24 = vcombine.low %v855_v54, %v933_v19  ;;  %v1011_v25 = vcombine.high %v855_v54, %v933_v19 }
 0x33c   : > { %v982_v26 = vrot.slane %v974_v20, %v4102_v13  ;;  %v989_v27 = vrot.slane %v975_v21, %v4102_v13  ;;  %v998_v28 = vrot.slane %v990_v22, %v4102_v13  ;;  %v1005_v29 = vrot.slane %v991_v23, %v4102_v13 }
 0x33d   : > { %v939_v30 = vpop.permute.xlu1 %938  ;;  %v1264_v35 = vpop.permute.xlu0 %1263  ;;  %v1018_v36 = vrot.slane %v1010_v24, %v4100_v6  ;;  %v1025_v37 = vrot.slane %v1011_v25, %v4100_v6 }
 0x33e   : > { %v1078_v31 = vcombine.low %v982_v26, %v989_v27  ;;  %v2951_v32 = vcombine.high %v982_v26, %v989_v27  ;;  %v1094_v33 = vcombine.low %v998_v28, %v1005_v29  ;;  %v2952_v34 = vcombine.high %v998_v28, %v1005_v29 }
 0x33f   : > { %v1026_v38 = vcombine.low %v927_v10, %v939_v30  ;;  %v1027_v39 = vcombine.high %v927_v10, %v939_v30  ;;  %v1275_v44 = vcombine.low %v4090_v58, %v1264_v35  ;;  %v1276_v45 = vcombine.high %v4090_v58, %v1264_v35 }
 0x340   : > { %v1085_v40 = vrot.slane %v1078_v31, %v4100_v6  ;;  %v1093_v41 = vrot.slane %v2951_v32, %v4100_v6  ;;  %v1101_v42 = vrot.slane %v1094_v33, %v4100_v6  ;;  %v1109_v43 = vrot.slane %v2952_v34, %v4100_v6 }
 0x341   : > { %v1034_v46 = vrot.slane %v1026_v38, %v4100_v6  ;;  %v1041_v47 = vrot.slane %v1027_v39, %v4100_v6  ;;  %v4124_v56 = vpop.permute.xlu1 %1259  ;;  %v1270_v11 = vpop.permute.xlu0 %1269  ;;  %v1283_v23 = vrot.slane %v1275_v44, %v4100_v6  ;;  %v1290_v24 = vrot.slane %v1276_v45, %v4100_v6 }
 0x342   : > { %v1110_v48 = vcombine.low %v1085_v40, %v1093_v41  ;;  %v1111_v49 = vcombine.high %v1085_v40, %v1093_v41  ;;  %v1126_v50 = vcombine.low %v1101_v42, %v1109_v43  ;;  %v1127_v51 = vcombine.high %v1101_v42, %v1109_v43 }
 0x343   : > { %v1042_v52 = vcombine.low %v1018_v36, %v1034_v46  ;;  %v1043_v53 = vcombine.high %v1018_v36, %v1034_v46  ;;  %v1058_v54 = vcombine.low %v1025_v37, %v1041_v47  ;;  %v1059_v55 = vcombine.high %v1025_v37, %v1041_v47 }
 0x344   : > { %v1118_v57 = vrot.slane %v1110_v48, %v4102_v13  ;;  %v1125_v60 = vrot.slane %v1111_v49, %v4102_v13  ;;  %v1134_v58 = vrot.slane %v1126_v50, %v4102_v13  ;;  %v1141_v61 = vrot.slane %v1127_v51, %v4102_v13 }
 0x345   : > { %v1050_v62 = vrot.slane %v1042_v52, %v4102_v13  ;;  %v1057_v63 = vrot.slane %v1043_v53, %v4102_v13  ;;  %v1066_v0 = vrot.slane %v1058_v54, %v4102_v13  ;;  %v1073_v1 = vrot.slane %v1059_v55, %v4102_v13  ;;  %v1266_v22 = vpop.permute.xlu1 %1265 }
 0x346   : > { %v1142_v2 = vcombine.low %v1118_v57, %v1134_v58  ;;  %v1143_v3 = vcombine.high %v1118_v57, %v1134_v58  ;;  %v1144_v4 = vcombine.low %v1125_v60, %v1141_v61  ;;  %v1145_v5 = vcombine.high %v1125_v60, %v1141_v61 }
 0x347   : > { %v1146_v7 = vcombine.low %v1050_v62, %v1057_v63  ;;  %v2953_v8 = vcombine.high %v1050_v62, %v1057_v63  ;;  %v1162_v9 = vcombine.low %v1066_v0, %v1073_v1  ;;  %v2954_v10 = vcombine.high %v1066_v0, %v1073_v1 }
 0x348   : > { %v3025_v12 = vpack.c.bf16 %v1142_v2, %v1142_v2  ;;  %v3027_v14 = vpack.c.bf16 %v1143_v3, %v1143_v3  ;;  %v3029_v15 = vpack.c.bf16 %v1144_v4, %v1144_v4  ;;  %v3031_v16 = vpack.c.bf16 %v1145_v5, %v1145_v5 }
 0x349   : > { %v1153_v17 = vrot.slane %v1146_v7, %v4100_v6  ;;  %v1161_v19 = vrot.slane %v2953_v8, %v4100_v6  ;;  %v1169_v20 = vrot.slane %v1162_v9, %v4100_v6  ;;  %v1177_v21 = vrot.slane %v2954_v10, %v4100_v6  ;;  %v1272_v49 = vpop.permute.xlu1 %1271 }
 0x34a   : > { %1247 = vst.msk [vmem:[#allocation2] sm:$0xf] %vm1246_vm6, %v3025_v12  ;;  %1249 = vst.msk [vmem:[#allocation2 + $0x8] sm:$0xf] %vm1246_vm6, %v3027_v14  ;;  %v1291_v25 = vcombine.low %v4108_v18, %v1270_v11  ;;  %v1292_v26 = vcombine.high %v4108_v18, %v1270_v11  ;;  %v1343_v33 = vcombine.low %v4094_v59, %v1266_v22 }
 0x34b   : > { %1251 = vst.msk [vmem:[#allocation2 + $0x10] sm:$0xf] %vm1246_vm6, %v3029_v15  ;;  %1253 = vst.msk [vmem:[#allocation2 + $0x18] sm:$0xf] %vm1246_vm6, %v3031_v16  ;;  %v1178_v27 = vcombine.low %v1153_v17, %v1161_v19  ;;  %v1179_v28 = vcombine.high %v1153_v17, %v1161_v19  ;;  %v1194_v29 = vcombine.low %v1169_v20, %v1177_v21 }
 0x34c   : > { %v1195_v30 = vcombine.high %v1169_v20, %v1177_v21  ;;  %v1299_v31 = vrot.slane %v1291_v25, %v4100_v6  ;;  %v1306_v32 = vrot.slane %v1292_v26, %v4100_v6  ;;  %v1344_v34 = vcombine.high %v4094_v59, %v1266_v22 }
 0x34d   : > { %v1186_v35 = vrot.slane %v1178_v27, %v4102_v13  ;;  %v1193_v36 = vrot.slane %v1179_v28, %v4102_v13  ;;  %v1202_v37 = vrot.slane %v1194_v29, %v4102_v13  ;;  %v1359_v58 = vcombine.low %v4124_v56, %v1272_v49 }
 0x34e   : > { %v1209_v18 = vrot.slane %v1195_v30, %v4102_v13  ;;  %v1307_v38 = vcombine.low %v1283_v23, %v1299_v31  ;;  %v1308_v39 = vcombine.high %v1283_v23, %v1299_v31  ;;  %v1323_v40 = vcombine.low %v1290_v24, %v1306_v32 }
 0x34f   : > { %v1324_v41 = vcombine.high %v1290_v24, %v1306_v32  ;;  %v1210_v42 = vcombine.low %v1186_v35, %v1202_v37  ;;  %v1211_v43 = vcombine.high %v1186_v35, %v1202_v37  ;;  %v1360_v61 = vcombine.high %v4124_v56, %v1272_v49 }
 0x350   : > { %v1212_v44 = vcombine.low %v1193_v36, %v1209_v18  ;;  %v1213_v45 = vcombine.high %v1193_v36, %v1209_v18  ;;  %v1315_v46 = vrot.slane %v1307_v38, %v4102_v13  ;;  %v1322_v59 = vrot.slane %v1308_v39, %v4102_v13 }
 0x351   : > { %v1331_v47 = vrot.slane %v1323_v40, %v4102_v13  ;;  %v1338_v48 = vrot.slane %v1324_v41, %v4102_v13  ;;  %v3026_v50 = vpack.c.bf16 %v1210_v42, %v1210_v42  ;;  %v3028_v51 = vpack.c.bf16 %v1211_v43, %v1211_v43 }
 0x352   : > { %v3030_v52 = vpack.c.bf16 %v1212_v44, %v1212_v44  ;;  %v3032_v53 = vpack.c.bf16 %v1213_v45, %v1213_v45  ;;  %v1411_v54 = vcombine.low %v1315_v46, %v1322_v59  ;;  %v2963_v55 = vcombine.high %v1315_v46, %v1322_v59 }
 0x353   : > { %v1427_v57 = vcombine.low %v1331_v47, %v1338_v48  ;;  %v2964_v60 = vcombine.high %v1331_v47, %v1338_v48  ;;  %1248 = vst.msk [vmem:[#allocation2 + $0x4] sm:$0xf] %vm1246_vm6, %v3026_v50  ;;  %1250 = vst.msk [vmem:[#allocation2 + $0xc] sm:$0xf] %vm1246_vm6, %v3028_v51  ;;  %v1351_v2 = vrot.slane %v1343_v33, %v4100_v6 }
 0x354   : > { %1252 = vst.msk [vmem:[#allocation2 + $0x14] sm:$0xf] %vm1246_vm6, %v3030_v52  ;;  %1254 = vst.msk [vmem:[#allocation2 + $0x1c] sm:$0xf] %vm1246_vm6, %v3032_v53  ;;  %v1418_v62 = vrot.slane %v1411_v54, %v4100_v6  ;;  %v1426_v63 = vrot.slane %v2963_v55, %v4100_v6  ;;  %v1358_v3 = vrot.slane %v1344_v34, %v4100_v6 }
 0x355   : > { %v1434_v0 = vrot.slane %v1427_v57, %v4100_v6  ;;  %v1442_v1 = vrot.slane %v2964_v60, %v4100_v6  ;;  %v1367_v4 = vrot.slane %v1359_v58, %v4100_v6  ;;  %v1374_v5 = vrot.slane %v1360_v61, %v4100_v6 }
 0x356   : > { %v1443_v7 = vcombine.low %v1418_v62, %v1426_v63  ;;  %v1444_v8 = vcombine.high %v1418_v62, %v1426_v63 }
 0x357   : > { %v1459_v9 = vcombine.low %v1434_v0, %v1442_v1  ;;  %v1460_v56 = vcombine.high %v1434_v0, %v1442_v1  ;;  %v1375_v10 = vcombine.low %v1351_v2, %v1367_v4  ;;  %v1376_v11 = vcombine.high %v1351_v2, %v1367_v4 }
 0x358   : > { %v1391_v12 = vcombine.low %v1358_v3, %v1374_v5  ;;  %v1392_v14 = vcombine.high %v1358_v3, %v1374_v5  ;;  %v1451_v15 = vrot.slane %v1443_v7, %v4102_v13  ;;  %v1458_v16 = vrot.slane %v1444_v8, %v4102_v13 }
 0x359   : > { %v1467_v17 = vrot.slane %v1459_v9, %v4102_v13  ;;  %v1474_v19 = vrot.slane %v1460_v56, %v4102_v13  ;;  %v1383_v20 = vrot.slane %v1375_v10, %v4102_v13  ;;  %v1390_v21 = vrot.slane %v1376_v11, %v4102_v13 }
 0x35a   : > { %v1399_v22 = vrot.slane %v1391_v12, %v4102_v13  ;;  %v1406_v23 = vrot.slane %v1392_v14, %v4102_v13 }
 0x35b   : > { %v1475_v24 = vcombine.low %v1451_v15, %v1467_v17  ;;  %v1476_v25 = vcombine.high %v1451_v15, %v1467_v17  ;;  %v1477_v26 = vcombine.low %v1458_v16, %v1474_v19  ;;  %v1478_v27 = vcombine.high %v1458_v16, %v1474_v19 }
 0x35c   : > { %v1479_v28 = vcombine.low %v1383_v20, %v1390_v21  ;;  %v2965_v29 = vcombine.high %v1383_v20, %v1390_v21  ;;  %v1495_v30 = vcombine.low %v1399_v22, %v1406_v23  ;;  %v2966_v31 = vcombine.high %v1399_v22, %v1406_v23 }
 0x35d   : > { %v3033_v32 = vpack.c.bf16 %v1475_v24, %v1475_v24  ;;  %v3035_v33 = vpack.c.bf16 %v1476_v25, %v1476_v25  ;;  %v3037_v34 = vpack.c.bf16 %v1477_v26, %v1477_v26  ;;  %v3039_v35 = vpack.c.bf16 %v1478_v27, %v1478_v27 }
 0x35e   : > { %v1486_v36 = vrot.slane %v1479_v28, %v4100_v6  ;;  %v1494_v37 = vrot.slane %v2965_v29, %v4100_v6  ;;  %v1502_v18 = vrot.slane %v1495_v30, %v4100_v6  ;;  %v1510_v38 = vrot.slane %v2966_v31, %v4100_v6 }
 0x35f   : > { %1579 = vst.msk [vmem:[#allocation3] sm:$0xf] %vm1246_vm6, %v3033_v32  ;;  %1581 = vst.msk [vmem:[#allocation3 + $0x8] sm:$0xf] %vm1246_vm6, %v3035_v33 }
 0x360   : > { %1583 = vst.msk [vmem:[#allocation3 + $0x10] sm:$0xf] %vm1246_vm6, %v3037_v34  ;;  %1585 = vst.msk [vmem:[#allocation3 + $0x18] sm:$0xf] %vm1246_vm6, %v3039_v35  ;;  %v1511_v39 = vcombine.low %v1486_v36, %v1494_v37  ;;  %v1512_v40 = vcombine.high %v1486_v36, %v1494_v37  ;;  %v1527_v41 = vcombine.low %v1502_v18, %v1510_v38 }
 0x361   : > { %v1528_v42 = vcombine.high %v1502_v18, %v1510_v38 }
 0x362   : > { %v1519_v43 = vrot.slane %v1511_v39, %v4102_v13  ;;  %v1526_v44 = vrot.slane %v1512_v40, %v4102_v13  ;;  %v1535_v45 = vrot.slane %v1527_v41, %v4102_v13 }
 0x363   : > { %v1542_v6 = vrot.slane %v1528_v42, %v4102_v13 }
 0x364   : > { %v1543_v46 = vcombine.low %v1519_v43, %v1535_v45  ;;  %v1544_v59 = vcombine.high %v1519_v43, %v1535_v45 }
 0x365   : > { %v1545_v47 = vcombine.low %v1526_v44, %v1542_v6  ;;  %v1546_v48 = vcombine.high %v1526_v44, %v1542_v6 }
 0x366   : > { %v3034_v49 = vpack.c.bf16 %v1543_v46, %v1543_v46  ;;  %v3036_v50 = vpack.c.bf16 %v1544_v59, %v1544_v59 }
 0x367   : > { %v3038_v51 = vpack.c.bf16 %v1545_v47, %v1545_v47  ;;  %v3040_v52 = vpack.c.bf16 %v1546_v48, %v1546_v48 }
 0x368   : > { %1580 = vst.msk [vmem:[#allocation3 + $0x4] sm:$0xf] %vm1246_vm6, %v3034_v49  ;;  %1582 = vst.msk [vmem:[#allocation3 + $0xc] sm:$0xf] %vm1246_vm6, %v3036_v50 }
 0x369   : > { %1584 = vst.msk [vmem:[#allocation3 + $0x14] sm:$0xf] %vm1246_vm6, %v3038_v51  ;;  %1586 = vst.msk [vmem:[#allocation3 + $0x1c] sm:$0xf] %vm1246_vm6, %v3040_v52 }
 0x36a PF: > { %s2975_s6 = sshll.u32 %s3705_s30, 3  ;;  %vm1592_vm7 = vcmask 261120   ;;  %s4494_s8 = sld [smem:[#allocation32_spill]]  ;;  %v3740_v62 = vmov 0.0   ;;  %vm3741_vm8 = vmmov 0   ;;  %v3359_v22 = vld [vmem:[#allocation2] sm:$0xff]   ;;  %v1710_v29 = vlaneseq }
 0x36b   : > { %s1588_s7 = scalar_lea.vmem %s4071_s13, %s2975_s6  ;;  %3093 = vmatprep.subr.bf16.mxu0 %v3740_v62  ;;  %3097 = vmatprep.mubr.msk.bf16.mxu0 %vm3741_vm8, %v3740_v62  ;;  %v2976_v9 = vld [vmem:[%s4433_s14] ss:$0 sm:$0xff]  ;;  %v2978_v16 = vld [vmem:[#allocation7] ss:$0 sm:$0xff]  ;;  %s3742_s16 = smov 104   ;;  %v3360_v23 = vld [vmem:[#allocation2 + $0x8] sm:$0xff]  }
 0x36c   : > { %v4198_v13 = vld [vmem:[%s1588_s7] sm:$0xff]  ;;  %3101 = vmatprep.subr.bf16.mxu1 %v3740_v62  ;;  %3103 = vmatprep.mubr.msk.bf16.mxu1 %vm3741_vm8, %v3740_v62  ;;  %s3743_s3 = smov 120   ;;  %vm1858_vm11 = vcmask 64512   ;;  %s3744_s24 = smov 112   ;;  %v3745_v27 = vmov 1983009808  }
 0x36d   : > { %v1593_v53 = vsel %vm1592_vm7, %v4198_v13, 0.0  ;;  %v2977_v11 = vld [vmem:[%s4434_s15] ss:$0 sm:$0xff]  ;;  %v1863_v25 = vsel %vm1858_vm11, %v3359_v22, 0  ;;  %v1914_v26 = vsel %vm1858_vm11, %v3360_v23, 0  ;;  %v1708_v28 = vunpack.c.l.s4 %v3745_v27  ;;  %s3748_s17 = smov 8  }
 0x36e   : > { %1594 = vadd.xlane.f32.xlu0 %v1593_v53  ;;  %3102 = vmatpush3.bf16.xpose.msra.mxu1 %v1863_v25  ;;  %v3746_v30 = vmov 1934713408   ;;  %v1711_v33 = vshrl.u32 %v1710_v29, 7  ;;  %v2062_v22 = vld [vmem:[%s4044_s21] sm:$0xff]  ;;  %vm2069_vm12 = vcmask 130048   ;;  %s3747_s21 = smov 16  }
 0x36f   : > { %3113 = vmatprep.subr.bf16.mxu1 %v3740_v62  ;;  %v1740_v31 = vunpack.c.l.s4 %v3746_v30  ;;  %v1709_v32 = vunpack.c.0.s8 %v1708_v28  ;;  %v2992_v23 = vadd.f32 -1.0, %v2062_v22  ;;  %s3749_s25 = smov 24   ;;  %vm2472_vm13 = vcmask 195584   ;;  %s4495_s26 = sld [smem:[#allocation41_spill]] }
 0x370   : > { %v3357_v61 = vld [vmem:[%s4494_s8 + $0x8] sm:$0xff]   ;;  %v3358_v63 = vld [vmem:[%s4494_s8] sm:$0xff]   ;;  %s4498_s11 = sld [smem:[#allocation40_spill]]  ;;  %vm2686_vm0 = vcmask 523264   ;;  %s3020_s2 = sshll.u32 %s3709_s0, 1 }
 0x371   : > { %3094 = vmatpush3.bf16.msra.mxu0 %v3357_v61  ;;  %v1741_v36 = vunpack.c.0.s8 %v1740_v31  ;;  %v4231_v37 = vsub.s32 %v1709_v32, %v1711_v33  ;;  %s2744_s23 = sadd.s32 %s3705_s30, %s3020_s2  ;;  %s4499_s22 = sld [smem:[#allocation42_spill]] }
 0x372   : > { %3095 = vmatprep.subr.bf16.mxu0 %v3740_v62  ;;  %s2733_s30 = scalar_lea.sflag [#allocation6], %s4040_s9  ;;  %s3750_s6 = smov [#allocation18]  }
 0x373   : > { %v4233_v42 = vsub.s32 %v1741_v36, %v1711_v33  ;;  %s3613_s7 = sshll.u32 %s3750_s6, 4  ;;  %s3614_s7 = int_to_ptr.vmem [resolvable:$false] %s3613_s7 }
 0x374   : > { %s3615_s27 = scalar_lea.vmem %s3614_s7, 256 }
 0x375   : > { %3096 = vmatpush3.bf16.msra.mxu0 %v3358_v63 }
 0x376   : > { %3107 = vmatprep.subr.bf16.mxu0 %v3740_v62 }
 0x3f7   : > { %v1595_v54 = vpop.xlane.xlu0 %1594 }
 0x3f8   : > { %v1597_v55 = vmul.f32 0.03125, %v1595_v54 }
 0x3fa   : > { %v1598_v57 = vsub.f32 %v4198_v13, %v1597_v55 }
 0x3fc   : > { %v1599_v60 = vmul.f32 %v1598_v57, %v1598_v57  ;;  %v1619_v56 = vmul.f32 %v2976_v9, %v1598_v57 }
 0x3fe   : > { %v1600_v58 = vsel %vm1592_vm7, %v1599_v60, 0.0 }
 0x3ff   : > { %1601 = vadd.xlane.f32.xlu0 %v1600_v58 }
 0x488   : > { %v1602_v0 = vpop.xlane.xlu0 %1601 }
 0x489   : > { %v1603_v1 = vmul.f32 0.032258064, %v1602_v0 }
 0x48b   : > { %3375 = vrsqrt.f32 %v1603_v1  ;;  %vm1606_vm9 = vcmp.eq.f32.partialorder %v1603_v1, inf  ;;  %v1609_v4 = vand.u32 2147483648, %v1603_v1  ;;  %vm1608_vm10 = vcmp.eq.f32.partialorder %v1603_v1, 0.0 }
 0x498   : > { %v3376_v2 = vpop.eup %3375 }
 0x499   : > { %v1605_v3 = vmul.f32 %v3376_v2, %v1603_v1  ;;  %v3361_v2 = vld [vmem:[#allocation2 + $0x10] sm:$0xff]  }
 0x49b   : > { %v1607_v5 = vsel %vm1606_vm9, %v1603_v1, %v1605_v3  ;;  %v3362_v3 = vld [vmem:[#allocation2 + $0x18] sm:$0xff]  }
 0x49c   : > { %v1610_v7 = vsel %vm1608_vm10, %v1609_v4, %v1607_v5 }
 0x49d   : > { %v1611_v8 = vadd.f32 1e-06, %v1610_v7 }
 0x49f   : > { %3377 = vrcp.f32 %v1611_v8 }
 0x4ac   : > { %v3378_v10 = vpop.eup %3377 }
 0x4ad   : > { %v1620_v12 = vmul.f32 %v3378_v10, %v1619_v56  ;;  %v1965_v10 = vsel %vm1858_vm11, %v3361_v2, 0 }
 0x4af   : > { %v1627_v14 = vadd.f32 %v2977_v11, %v1620_v12  ;;  %v2016_v11 = vsel %vm1858_vm11, %v3362_v3, 0 }
 0x4b1   : > { %v1628_v15 = vpack.c.bf16 %v1627_v14, %v1627_v14 }
 0x4b3   : > { %3098 = vmatmul.mubr.msk.bf16.vlgmr.msra.gmra.mxu0 %vm1592_vm7, %v1628_v15 }
 0x4b4   : > { %3109 = vmatprep.mubr.msk.bf16.mxu0 %vm3741_vm8, %v3740_v62  ;;  %3108 = vmatpush3.bf16.xpose.msra.mxu0 %v1914_v26 }
 0x4b5   : > { %3119 = vmatprep.subr.bf16.mxu0 %v3740_v62 }
 0x573   : > { %v1689_v17 = vpop.f32.mrf.mxu0 }
 0x574   : > { %v1690_v19 = vadd.f32 %v2978_v16, %v1689_v17 }
 0x575   : > { %v3099_v20 = vpop.f32.mrf.mxu0 }
 0x576   : > { %1702 = vrot.lane.b32.xlu0 %v1690_v19, %s3742_s16  ;;  %1696 = vrot.lane.b32.xlu1 %v1690_v19, %s3743_s3  ;;  %s4496_s16 = sld [smem:[#allocation43_spill]]  ;;  %s3021_s3 = sshll.u32 %s2744_s23, 7 }
 0x577   : > { %v1692_v21 = vpop.f32.mrf.mxu0 }
 0x579   : > { %v3100_v24 = vpop.f32.mrf.mxu0 }
 0x57a   : > { %1699 = vrot.lane.b32.xlu1 %v1690_v19, %s3744_s24  ;;  %v2064_v24 = vmul.f32 1e+09, %v2992_v23  ;;  %s2748_s24 = sshll.u32 %s4073_s12, 4  ;;  %s4366_s24 = int_to_ptr.vmem [resolvable:$true] %s2748_s24 }
 0x57b   : > { %s3609_s0 = scalar_lea.vmem %s4366_s24, 128  ;;  %p3616_p11 = scmp.lt.s32.totalorder %s4366_s24, %s3614_s7 }
 0x57c   : > { %p3610_p8 = scmp.ne.s32.totalorder %s4366_s24, %s3609_s0  ;;  %p3617_p3 = scmp.lt.s32.totalorder %s3615_s27, %s3609_s0 }
 0x57e   : > { %p3611_p9 = pnand %p3610_p8, %p4007_p0  ;;  %p3618_p1 = por %p3617_p3, %p3616_p11 }
 0x580   : > { %p3612_p5 = pneg %p3611_p9 }
 0x582   : > { %p3619_p12 = pnand %p3618_p1, %p3612_p5 }
 0x5e8   : > { %v1703_v34 = vpop.permute.xlu0 %1702  ;;  %v1697_v35 = vpop.permute.xlu1 %1696 }
 0x5e9   : > { %v1721_v18 = vcombine.low %v1697_v35, %v1703_v34  ;;  %v1722_v38 = vcombine.high %v1697_v35, %v1703_v34 }
 0x5eb   : > { %v1729_v43 = vrot.slane %v1721_v18, %v4231_v37  ;;  %v1736_v44 = vrot.slane %v1722_v38, %v4231_v37 }
 0x5ec   : > { %v1700_v39 = vpop.permute.xlu1 %1699 }
 0x5ed   : > { %v1705_v40 = vcombine.low %v1690_v19, %v1700_v39  ;;  %v1706_v41 = vcombine.high %v1690_v19, %v1700_v39 }
 0x5ef   : > { %v1713_v45 = vrot.slane %v1705_v40, %v4231_v37  ;;  %v1720_v6 = vrot.slane %v1706_v41, %v4231_v37 }
 0x5f1   : > { %v1737_v46 = vcombine.low %v1713_v45, %v1729_v43  ;;  %v1738_v59 = vcombine.high %v1713_v45, %v1729_v43  ;;  %v1753_v47 = vcombine.low %v1720_v6, %v1736_v44  ;;  %v1754_v48 = vcombine.high %v1720_v6, %v1736_v44 }
 0x5f3   : > { %v1745_v49 = vrot.slane %v1737_v46, %v4233_v42  ;;  %v1752_v50 = vrot.slane %v1738_v59, %v4233_v42  ;;  %v1761_v51 = vrot.slane %v1753_v47, %v4233_v42  ;;  %v1768_v52 = vrot.slane %v1754_v48, %v4233_v42 }
 0x5f5   : > { %v1773_v53 = vcombine.low %v1745_v49, %v1752_v50  ;;  %v2982_v54 = vcombine.high %v1745_v49, %v1752_v50  ;;  %v1789_v55 = vcombine.low %v1761_v51, %v1768_v52  ;;  %v2983_v57 = vcombine.high %v1761_v51, %v1768_v52 }
 0x5f7   : > { %v1780_v60 = vrot.slane %v1773_v53, %v4231_v37  ;;  %v1788_v58 = vrot.slane %v2982_v54, %v4231_v37  ;;  %v1796_v61 = vrot.slane %v1789_v55, %v4231_v37  ;;  %v1804_v63 = vrot.slane %v2983_v57, %v4231_v37 }
 0x5f9   : > { %v1805_v0 = vcombine.low %v1780_v60, %v1788_v58  ;;  %v1821_v1 = vcombine.low %v1796_v61, %v1804_v63  ;;  %v1806_v4 = vcombine.high %v1780_v60, %v1788_v58  ;;  %v1822_v5 = vcombine.high %v1796_v61, %v1804_v63 }
 0x5fb   : > { %v1813_v7 = vrot.slane %v1805_v0, %v4233_v42  ;;  %v1829_v8 = vrot.slane %v1821_v1, %v4233_v42  ;;  %v1820_v15 = vrot.slane %v1806_v4, %v4233_v42  ;;  %v1836_v16 = vrot.slane %v1822_v5, %v4233_v42 }
 0x5fd   : > { %v1837_v9 = vcombine.low %v1813_v7, %v1829_v8  ;;  %v1838_v56 = vcombine.high %v1813_v7, %v1829_v8  ;;  %v1839_v17 = vcombine.low %v1820_v15, %v1836_v16  ;;  %v1840_v19 = vcombine.high %v1820_v15, %v1836_v16 }
 0x5ff   : > { %v1841_v12 = vpack.c.bf16 %v1837_v9, %v1837_v9  ;;  %v1842_v14 = vpack.c.bf16 %v1838_v56, %v1838_v56  ;;  %v1843_v20 = vpack.c.bf16 %v1839_v17, %v1839_v17  ;;  %v1844_v21 = vpack.c.bf16 %v1840_v19, %v1840_v19 }
 0x601   : > { %3104 = vmatmul.mubr.msk.bf16.vlgmr.msra.gmra.mxu1 %vm1858_vm11, %v1841_v12  ;;  %3110 = vmatmul.mubr.msk.bf16.vlgmr.msra.gmra.mxu0 %vm1858_vm11, %v1842_v14  ;;  %v3364_v12 = vld [vmem:[#allocation3 + $0x8] sm:$0xff]  }
 0x602   : > { %3114 = vmatpush3.bf16.xpose.msra.mxu1 %v1965_v10  ;;  %3120 = vmatpush3.bf16.xpose.msra.mxu0 %v2016_v11  ;;  %v3363_v11 = vld [vmem:[#allocation3] sm:$0xff]  }
 0x603   : > { %3115 = vmatprep.mubr.msk.bf16.mxu1 %vm3741_vm8, %v3740_v62  ;;  %3121 = vmatprep.mubr.msk.bf16.mxu0 %vm3741_vm8, %v3740_v62 }
 0x604   : > { %3125 = vmatprep.subr.bf16.mxu1 %v3740_v62  ;;  %3131 = vmatprep.subr.bf16.mxu0 %v3740_v62 }
 0x609   : > { %3116 = vmatmul.mubr.msk.bf16.vlgmr.msra.gmra.mxu1 %vm1858_vm11, %v1843_v20  ;;  %3122 = vmatmul.mubr.msk.bf16.vlgmr.msra.gmra.mxu0 %vm1858_vm11, %v1844_v21  ;;  %v3365_v21 = vld [vmem:[#allocation3 + $0x10] sm:$0xff]  }
 0x60a   : > { %3127 = vmatprep.mubr.msk.bf16.mxu1 %vm3741_vm8, %v3740_v62  ;;  %3133 = vmatprep.mubr.msk.bf16.mxu0 %vm3741_vm8, %v3740_v62 }
 0x60b   : > { %3126 = vmatpush3.bf16.msra.mxu1 %v3363_v11  ;;  %3132 = vmatpush3.bf16.msra.mxu0 %v3364_v12 }
 0x60c   : > { %3137 = vmatprep.subr.bf16.mxu1 %v3740_v62  ;;  %3143 = vmatprep.subr.bf16.mxu0 %v3740_v62 }
 0x6c1   : > { %v1899_v25 = vpop.f32.mrf.mxu1  ;;  %v1950_v26 = vpop.f32.mrf.mxu0 }
 0x6c2   : > { %v2058_v27 = vmul.f32 0.35355338, %v1899_v25  ;;  %v2059_v28 = vmul.f32 0.35355338, %v1950_v26  ;;  %v3366_v25 = vld [vmem:[#allocation3 + $0x18] sm:$0xff]  }
 0x6c3   : > { %v3105_v29 = vpop.f32.mrf.mxu1  ;;  %v3111_v30 = vpop.f32.mrf.mxu0 }
 0x6c4   : > { %v2065_v31 = vadd.f32 %v2064_v24, %v2058_v27  ;;  %v2066_v32 = vadd.f32 %v2064_v24, %v2059_v28 }
 0x6c5   : > { %v1902_v33 = vpop.f32.mrf.mxu1  ;;  %v1953_v34 = vpop.f32.mrf.mxu0 }
 0x6c6   : > { %v2070_v35 = vsel %vm2069_vm12, %v2065_v31, -inf  ;;  %v2073_v36 = vsel %vm2069_vm12, %v2066_v32, -inf  ;;  %v3367_v33 = vld [vmem:[#allocation15 + $0x8] sm:$0xff]  }
 0x6c7   : > { %2071 = vmax.xlane.f32.xlu1 %v2070_v35  ;;  %v3106_v18 = vpop.f32.mrf.mxu1  ;;  %2074 = vmax.xlane.f32.xlu0 %v2073_v36  ;;  %v3112_v38 = vpop.f32.mrf.mxu0 }
 0x6c9   : > { %v2001_v39 = vpop.f32.mrf.mxu1  ;;  %v2052_v40 = vpop.f32.mrf.mxu0 }
 0x6ca   : > { %v2060_v41 = vmul.f32 0.35355338, %v2001_v39  ;;  %v2061_v43 = vmul.f32 0.35355338, %v2052_v40 }
 0x6cb   : > { %v3117_v44 = vpop.f32.mrf.mxu1  ;;  %v3123_v45 = vpop.f32.mrf.mxu0 }
 0x6cc   : > { %v2067_v6 = vadd.f32 %v2064_v24, %v2060_v41  ;;  %v2068_v48 = vadd.f32 %v2064_v24, %v2061_v43 }
 0x6cd   : > { %v2004_v46 = vpop.f32.mrf.mxu1  ;;  %v2055_v59 = vpop.f32.mrf.mxu0 }
 0x6ce   : > { %v2076_v47 = vsel %vm2069_vm12, %v2067_v6, -inf  ;;  %v2079_v51 = vsel %vm2069_vm12, %v2068_v48, -inf }
 0x6cf   : > { %2077 = vmax.xlane.f32.xlu1 %v2076_v47  ;;  %v3118_v49 = vpop.f32.mrf.mxu1  ;;  %v3124_v50 = vpop.f32.mrf.mxu0 }
 0x6d3   : > { %2080 = vmax.xlane.f32.xlu1 %v2079_v51 }
 0x750   : > { %v2072_v52 = vpop.xlane.xlu1 %2071  ;;  %v2075_v53 = vpop.xlane.xlu0 %2074 }
 0x751   : > { %v2082_v54 = vsub.f32 %v2065_v31, %v2072_v52  ;;  %v2083_v55 = vsub.f32 %v2066_v32, %v2075_v53 }
 0x753   : > { %v2086_v57 = vmul.f32 1.442695, %v2082_v54  ;;  %v2088_v60 = vmul.f32 1.442695, %v2083_v55 }
 0x755   : > { %3379 = vpow2.f32 %v2086_v57 }
 0x756   : > { %3381 = vpow2.f32 %v2088_v60 }
 0x758   : > { %v2078_v58 = vpop.xlane.xlu1 %2077 }
 0x759   : > { %v2084_v61 = vsub.f32 %v2067_v6, %v2078_v58 }
 0x75b   : > { %v2090_v63 = vmul.f32 1.442695, %v2084_v61 }
 0x75c   : > { %v2081_v0 = vpop.xlane.xlu1 %2080 }
 0x75d   : > { %3383 = vpow2.f32 %v2090_v63  ;;  %v2085_v1 = vsub.f32 %v2068_v48, %v2081_v0  ;;  %v3368_v0 = vld [vmem:[#allocation15] sm:$0xff]  }
 0x75f   : > { %v2092_v2 = vmul.f32 1.442695, %v2085_v1 }
 0x761   : > { %3385 = vpow2.f32 %v2092_v2 }
 0x762   : > { %v3380_v3 = vpop.eup %3379 }
 0x763   : > { %v2094_v4 = vsel %vm2069_vm12, %v3380_v3, 0.0  ;;  %v3382_v5 = vpop.eup %3381 }
 0x764   : > { %2095 = vadd.xlane.f32.xlu1 %v2094_v4  ;;  %v2097_v7 = vsel %vm2069_vm12, %v3382_v5, 0.0 }
 0x768   : > { %2098 = vadd.xlane.f32.xlu1 %v2097_v7 }
 0x76a   : > { %v3384_v8 = vpop.eup %3383 }
 0x76b   : > { %v2100_v9 = vsel %vm2069_vm12, %v3384_v8, 0.0 }
 0x76c   : > { %2101 = vadd.xlane.f32.xlu1 %v2100_v9 }
 0x76e   : > { %v3386_v56 = vpop.eup %3385 }
 0x76f   : > { %v2103_v10 = vsel %vm2069_vm12, %v3386_v56, 0.0 }
 0x770   : > { %2104 = vadd.xlane.f32.xlu0 %v2103_v10 }
 0x7ed   : > { %v2096_v14 = vpop.xlane.xlu1 %2095 }
 0x7ee   : > { %3387 = vrcp.f32 %v2096_v14 }
 0x7f1   : > { %v2099_v15 = vpop.xlane.xlu1 %2098 }
 0x7f2   : > { %3389 = vrcp.f32 %v2099_v15 }
 0x7f5   : > { %v2102_v16 = vpop.xlane.xlu1 %2101 }
 0x7f6   : > { %3391 = vrcp.f32 %v2102_v16 }
 0x7f9   : > { %v2105_v17 = vpop.xlane.xlu0 %2104 }
 0x7fa   : > { %3393 = vrcp.f32 %v2105_v17 }
 0x7fb   : > { %v3388_v19 = vpop.eup %3387 }
 0x7fc   : > { %v2110_v20 = vmul.f32 %v3388_v19, %v3380_v3 }
 0x7fe   : > { %v2114_v22 = vpack.c.bf16 %v2110_v20, %v2110_v20 }
 0x7ff   : > { %v3390_v23 = vpop.eup %3389 }
 0x800   : > { %3128 = vmatmul.mubr.msk.bf16.vlgmr.msra.gmra.mxu1 %vm2069_vm12, %v2114_v22  ;;  %v2111_v24 = vmul.f32 %v3390_v23, %v3382_v5 }
 0x801   : > { %3138 = vmatpush3.bf16.msra.mxu1 %v3365_v21  ;;  %3139 = vmatprep.mubr.msk.bf16.mxu1 %vm3741_vm8, %v3740_v62 }
 0x802   : > { %v2115_v26 = vpack.c.bf16 %v2111_v24, %v2111_v24  ;;  %3149 = vmatprep.subr.bf16.mxu1 %v3740_v62 }
 0x803   : > { %v3392_v27 = vpop.eup %3391 }
 0x804   : > { %3134 = vmatmul.mubr.msk.bf16.vlgmr.msra.gmra.mxu0 %vm2069_vm12, %v2115_v26  ;;  %v2112_v28 = vmul.f32 %v3392_v27, %v3384_v8 }
 0x805   : > { %3144 = vmatpush3.bf16.msra.mxu0 %v3366_v25  ;;  %3145 = vmatprep.mubr.msk.bf16.mxu0 %vm3741_vm8, %v3740_v62 }
 0x806   : > { %v2116_v29 = vpack.c.bf16 %v2112_v28, %v2112_v28  ;;  %3157 = vmatprep.subr.bf16.mxu0 %v3740_v62 }
 0x807   : > { %v3394_v30 = vpop.eup %3393 }
 0x808   : > { %3140 = vmatmul.mubr.msk.bf16.vlgmr.msra.gmra.mxu1 %vm2069_vm12, %v2116_v29  ;;  %v2113_v31 = vmul.f32 %v3394_v30, %v3386_v56 }
 0x809   : > { %3153 = vmatprep.mubr.msk.bf16.mxu1 %vm3741_vm8, %v3740_v62  ;;  %3150 = vmatpush3.bf16.msra.mxu1 %v3367_v33 }
 0x80a   : > { %v2117_v32 = vpack.c.bf16 %v2113_v31, %v2113_v31  ;;  %3151 = vmatprep.subr.bf16.mxu1 %v3740_v62 }
 0x80c   : > { %3146 = vmatmul.mubr.msk.bf16.vlgmr.msra.gmra.mxu0 %vm2069_vm12, %v2117_v32  ;;  %v3003_v32 = vld [vmem:[#allocation16] ss:$0 sm:$0xff] }
 0x80d   : > { %3161 = vmatprep.mubr.msk.bf16.mxu0 %vm3741_vm8, %v3740_v62  ;;  %3152 = vmatpush3.bf16.msra.mxu1 %v3368_v0 }
 0x80e   : > { %3165 = vmatprep.subr.bf16.mxu1 %v3740_v62 }
 0x8c0   : > { %v2169_v34 = vpop.f32.mrf.mxu1 }
 0x8c2   : > { %v3129_v35 = vpop.f32.mrf.mxu1 }
 0x8c4   : > { %v2172_v36 = vpop.f32.mrf.mxu1  ;;  %v2218_v18 = vpop.f32.mrf.mxu0 }
 0x8c6   : > { %v3130_v38 = vpop.f32.mrf.mxu1  ;;  %v3135_v39 = vpop.f32.mrf.mxu0 }
 0x8c8   : > { %v2221_v40 = vpop.f32.mrf.mxu0  ;;  %v2267_v41 = vpop.f32.mrf.mxu1 }
 0x8c9   : > { %v2322_v45 = vcombine.low %v2169_v34, %v2267_v41  ;;  %v2323_v6 = vcombine.high %v2169_v34, %v2267_v41 }
 0x8ca   : > { %v3136_v43 = vpop.f32.mrf.mxu0  ;;  %v3141_v44 = vpop.f32.mrf.mxu1 }
 0x8cb   : > { %v2330_v51 = vrot.slane %v2322_v45, %v4231_v37  ;;  %v2337_v52 = vrot.slane %v2323_v6, %v4231_v37  ;;  %v3369_v6 = vld [vmem:[%s4429_s10 + $0x8] sm:$0xff]  }
 0x8cc   : > { %v2270_v46 = vpop.f32.mrf.mxu1  ;;  %v2316_v59 = vpop.f32.mrf.mxu0  ;;  %3158 = vmatpush3.bf16.msra.mxu0 %v3369_v6 }
 0x8cd   : > { %v2338_v47 = vcombine.low %v2218_v18, %v2316_v59  ;;  %v2339_v48 = vcombine.high %v2218_v18, %v2316_v59  ;;  %3159 = vmatprep.subr.bf16.mxu0 %v3740_v62  ;;  %v3371_v46 = vld [vmem:[%s4495_s26 + $0x18] sm:$0xff]   ;;  %v3372_v59 = vld [vmem:[%s4495_s26 + $0x10] sm:$0xff]  }
 0x8ce   : > { %v3142_v49 = vpop.f32.mrf.mxu1  ;;  %v3147_v50 = vpop.f32.mrf.mxu0 }
 0x8cf   : > { %v2346_v53 = vrot.slane %v2338_v47, %v4231_v37  ;;  %v2353_v54 = vrot.slane %v2339_v48, %v4231_v37 }
 0x8d0   : > { %v2319_v55 = vpop.f32.mrf.mxu0 }
 0x8d1   : > { %v2354_v57 = vcombine.low %v2330_v51, %v2346_v53  ;;  %v2355_v60 = vcombine.high %v2330_v51, %v2346_v53  ;;  %v2370_v58 = vcombine.low %v2337_v52, %v2353_v54  ;;  %v2371_v61 = vcombine.high %v2337_v52, %v2353_v54  ;;  %v3007_v55 = vld [vmem:[%s4496_s16] ss:$0 sm:$0xff] }
 0x8d2   : > { %v3148_v63 = vpop.f32.mrf.mxu0 }
 0x8d3   : > { %v2362_v1 = vrot.slane %v2354_v57, %v4233_v42  ;;  %v2369_v2 = vrot.slane %v2355_v60, %v4233_v42  ;;  %v2378_v3 = vrot.slane %v2370_v58, %v4233_v42  ;;  %v2385_v4 = vrot.slane %v2371_v61, %v4233_v42 }
 0x8d5   : > { %v2390_v5 = vcombine.low %v2362_v1, %v2369_v2  ;;  %v3001_v7 = vcombine.high %v2362_v1, %v2369_v2  ;;  %v2406_v8 = vcombine.low %v2378_v3, %v2385_v4  ;;  %v3002_v9 = vcombine.high %v2378_v3, %v2385_v4  ;;  %v3373_v1 = vld [vmem:[%s4495_s26 + $0x8] sm:$0xff]   ;;  %v3374_v2 = vld [vmem:[%s4495_s26] sm:$0xff]  }
 0x8d6   : > { %v3009_v3 = vld [vmem:[%s4498_s11] ss:$0 sm:$0xff] }
 0x8d7   : > { %v2397_v56 = vrot.slane %v2390_v5, %v4231_v37  ;;  %v2405_v10 = vrot.slane %v3001_v7, %v4231_v37  ;;  %v2413_v11 = vrot.slane %v2406_v8, %v4231_v37  ;;  %v2421_v12 = vrot.slane %v3002_v9, %v4231_v37 }
 0x8d9   : > { %v2423_v14 = vcombine.high %v2397_v56, %v2405_v10  ;;  %v2439_v15 = vcombine.high %v2413_v11, %v2421_v12  ;;  %v2422_v16 = vcombine.low %v2397_v56, %v2405_v10  ;;  %v2438_v17 = vcombine.low %v2413_v11, %v2421_v12 }
 0x8db   : > { %v2437_v19 = vrot.slane %v2423_v14, %v4233_v42  ;;  %v2453_v20 = vrot.slane %v2439_v15, %v4233_v42  ;;  %v2430_v21 = vrot.slane %v2422_v16, %v4233_v42  ;;  %v2446_v22 = vrot.slane %v2438_v17, %v4233_v42 }
 0x8dd   : > { %v2456_v23 = vcombine.low %v2437_v19, %v2453_v20  ;;  %v2455_v24 = vcombine.high %v2430_v21, %v2446_v22  ;;  %v2454_v25 = vcombine.low %v2430_v21, %v2446_v22  ;;  %v2457_v37 = vcombine.high %v2437_v19, %v2453_v20 }
 0x8df   : > { %2463 = vrot.lane.b32.xlu0 %v2456_v23, %s3747_s21  ;;  %2459 = vrot.lane.b32.xlu1 %v2455_v24, %s3748_s17  ;;  %s4497_s21 = sld [smem:[#allocation44_spill]] }
 0x8e3   : > { %2467 = vrot.lane.b32.xlu1 %v2457_v37, %s3749_s25  ;;  %s4501_s25 = sld [smem:[#allocation45_spill]] }
 0x8e5   : > { %v3008_v58 = vld [vmem:[%s4497_s21] ss:$0 sm:$0xff] }
 0x8e9   : > { %s4364_s5 = scalar_lea.hbm %s4501_s25, %s3021_s3 }
 0x951   : > { %v2460_v26 = vpop.permute.xlu1 %2459  ;;  %v2464_v27 = vpop.permute.xlu0 %2463 }
 0x952   : > { %v2470_v28 = vsel %vm1858_vm11, %v2454_v25, %v2460_v26 }
 0x953   : > { %v2471_v30 = vsel %vm2069_vm12, %v2470_v28, %v2464_v27 }
 0x955   : > { %v2468_v29 = vpop.permute.xlu1 %2467 }
 0x956   : > { %v2473_v31 = vsel %vm2472_vm13, %v2471_v30, %v2468_v29 }
 0x957   : > { %v2474_v42 = vpack.c.bf16 %v2473_v31, %v2473_v31 }
 0x959   : > { %3154 = vmatmul.mubr.msk.bf16.vlgmr.msra.gmra.mxu1 %vm1592_vm7, %v2474_v42 }
 0x95a   : > { %3173 = vmatprep.mubr.msk.bf16.mxu1 %vm3741_vm8, %v3740_v62  ;;  %3166 = vmatpush3.bf16.msra.mxu1 %v3371_v46 }
 0x95b   : > { %3167 = vmatprep.subr.bf16.mxu1 %v3740_v62 }
 0x95e   : > { %3168 = vmatpush3.bf16.msra.mxu1 %v3372_v59 }
 0x95f   : > { %3169 = vmatprep.subr.bf16.mxu1 %v3740_v62 }
 0x962   : > { %3170 = vmatpush3.bf16.msra.mxu1 %v3373_v1 }
 0x963   : > { %3171 = vmatprep.subr.bf16.mxu1 %v3740_v62  ;;  %v3013_v62 = vld [vmem:[%s4499_s22] ss:$0 sm:$0xff] }
 0x966   : > { %3172 = vmatpush3.bf16.msra.mxu1 %v3374_v2 }
 0xa19   : > { %v2535_v33 = vpop.f32.mrf.mxu1 }
 0xa1a   : > { %v2536_v34 = vadd.f32 %v3003_v32, %v2535_v33 }
 0xa1b   : > { %v3155_v35 = vpop.f32.mrf.mxu1 }
 0xa1c   : > { %v4316_v36 = vadd.f32 %v2536_v34, %v4198_v13  ;;  %v3370_v13 = vld [vmem:[%s4429_s10] sm:$0xff]  }
 0xa1d   : > { %v2538_v18 = vpop.f32.mrf.mxu1  ;;  %3160 = vmatpush3.bf16.msra.mxu0 %v3370_v13 }
 0xa1e   : > { %v2544_v38 = vsel %vm1592_vm7, %v4316_v36, 0.0 }
 0xa1f   : > { %2545 = vadd.xlane.f32.xlu1 %v2544_v38  ;;  %v3156_v39 = vpop.f32.mrf.mxu1 }
 0xaa8   : > { %v2546_v40 = vpop.xlane.xlu1 %2545 }
 0xaa9   : > { %v2547_v41 = vmul.f32 0.03125, %v2546_v40 }
 0xaab   : > { %v2548_v43 = vsub.f32 %v4316_v36, %v2547_v41 }
 0xaad   : > { %v2549_v44 = vmul.f32 %v2548_v43, %v2548_v43  ;;  %v2569_v57 = vmul.f32 %v3007_v55, %v2548_v43 }
 0xaaf   : > { %v2550_v45 = vsel %vm1592_vm7, %v2549_v44, 0.0 }
 0xab0   : > { %2551 = vadd.xlane.f32.xlu0 %v2550_v45 }
 0xb39   : > { %v2552_v47 = vpop.xlane.xlu0 %2551 }
 0xb3a   : > { %v2553_v48 = vmul.f32 0.032258064, %v2552_v47 }
 0xb3c   : > { %3395 = vrsqrt.f32 %v2553_v48  ;;  %vm2556_vm14 = vcmp.eq.f32.partialorder %v2553_v48, inf  ;;  %v2559_v51 = vand.u32 2147483648, %v2553_v48  ;;  %vm2558_vm15 = vcmp.eq.f32.partialorder %v2553_v48, 0.0 }
 0xb49   : > { %v3396_v49 = vpop.eup %3395 }
 0xb4a   : > { %v2555_v50 = vmul.f32 %v3396_v49, %v2553_v48 }
 0xb4c   : > { %v2557_v52 = vsel %vm2556_vm14, %v2553_v48, %v2555_v50 }
 0xb4d   : > { %v2560_v53 = vsel %vm2558_vm15, %v2559_v51, %v2557_v52 }
 0xb4e   : > { %v2561_v54 = vadd.f32 1e-06, %v2560_v53 }
 0xb50   : > { %3397 = vrcp.f32 %v2561_v54 }
 0xb5d   : > { %v3398_v60 = vpop.eup %3397 }
 0xb5e   : > { %v2570_v61 = vmul.f32 %v3398_v60, %v2569_v57 }
 0xb60   : > { %v2577_v63 = vadd.f32 %v3008_v58, %v2570_v61 }
 0xb62   : > { %v2578_v0 = vpack.c.bf16 %v2577_v63, %v2577_v63 }
 0xb64   : > { %3162 = vmatmul.mubr.msk.bf16.vlgmr.msra.gmra.mxu0 %vm1592_vm7, %v2578_v0 }
 0xc24   : > { %v2639_v4 = vpop.f32.mrf.mxu0 }
 0xc25   : > { %v2640_v5 = vadd.f32 %v3009_v3, %v2639_v4 }
 0xc26   : > { %v3163_v7 = vpop.f32.mrf.mxu0 }
 0xc27   : > { %v2645_v8 = vmax.f32 %v2640_v5, 0.0 }
 0xc28   : > { %v2642_v9 = vpop.f32.mrf.mxu0 }
 0xc29   : > { %v2646_v56 = vpack.c.bf16 %v2645_v8, %v2645_v8 }
 0xc2a   : > { %v3164_v10 = vpop.f32.mrf.mxu0 }
 0xc2b   : > { %3174 = vmatmul.mubr.msk.bf16.vlgmr.msra.gmra.mxu1 %vm2686_vm0, %v2646_v56 }
 0xceb   : > { %v2724_v11 = vpop.f32.mrf.mxu1 }
 0xcec   : > { %v2725_v12 = vadd.f32 %v3013_v62, %v2724_v11 }
 0xced   : > { %v3175_v14 = vpop.f32.mrf.mxu1 }
 0xcee   : > { %v2730_v15 = vadd.f32 %v2725_v12, %v4316_v36 }
 0xcef   : > { %v2727_v16 = vpop.f32.mrf.mxu1 }
 0xcf0   : > { %2731 = vst.msk [vmem:[%s4073_s12] sm:$0xff] %vm1592_vm7, %v2730_v15 }
 0xcf1   : > { %v3176_v17 = vpop.f32.mrf.mxu1 }
 0xcf2   : > { %3622 = shalt.err (!%p3619_p12)
}
 0xcf3   : > { %s3623_s12 = scalar_lea.hbm %s4364_s5, 128  ;;  %s3627_s2 = scalar_lea.hbm %s4501_s25, 512 }
 0xcf4   : > { %p3624_p7 = scmp.ne.s32.totalorder %s4364_s5, %s3623_s12  ;;  %p3628_p13 = scmp.lt.s32.totalorder %s4364_s5, %s4501_s25 }
 0xcf5   : > { %p3629_p6 = scmp.lt.s32.totalorder %s3627_s2, %s3623_s12 }
 0xcf6   : > { %p3625_p10 = pnand %p3624_p7, %p4007_p0 }
 0xcf7   : > { %p3630_p8 = por %p3629_p6, %p3628_p13 }
 0xcf8   : > { %p3626_p4 = pneg %p3625_p10 }
 0xcfa   : > { %p3631_p9 = pnand %p3630_p8, %p3626_p4 }
 0xcfc   : > { %3634 = shalt.err (!%p3631_p9)
}
 0xcfd   : > { %3207 = dma.vmem_to_hbm [thread:$0]  (%p4007_p0), %s4366_s24, 128, %s4364_s5, %s2733_s30  }
 0xcfe PF: > { %s4502_s13 = sld [smem:[#allocation25_spill]]  ;;  %p3254_p5 = scmp.ge.s32.totalorder %s3721_s20, 2 }
 0xd00   : > { %p3236_p11 = pnand %p3254_p5, %p4013_p2 }
 0xd02   : > { %p3237_p3 = pneg %p3236_p11 }
 0xd04   : > { %s2760_s3 = sand.u32 1, %s4502_s13  }
 0xd05   : > { %s2761_s21 = scalar_lea.sflag [#allocation6], %s2760_s3 }
 0xd06   : > { %3688 = dma.done.wait (%p3237_p3), %s2761_s21, 128  }
 0xd07   : > { %3690 = vsyncadd (%p3237_p3), %s2761_s21, 4294967168  ;;  %s38_s20 = sadd.s32 1, %s3721_s20   ;;  %s4504_s16 = sld [smem:[#allocation26_spill]] }
 0xd08   : > { %p35_p1 = scmp.ge.s32.totalorder %s38_s20, 6   ;;  %s4505_s24 = sld [smem:[#allocation27_spill]] }
 0xd09   : > { %s4506_s27 = smov %s3697_s28  ;;  %s4507_s28 = smov %s3701_s29 }
 0xd0a   : > { %s4508_s29 = smov %s4020_s4  ;;  %s4509_s30 = smov %s3713_s19 }
 0xd0b   : > { %s4510_s0 = smov %s3717_s1  ;;  %37 = sbr.rel (!%p35_p1) target bundleno = 28 (0x1c), region = 173 }
 0xd0d   : > { %s4511_s19 = smov %s4504_s16 }
 0xd0e   : > { %s4512_s1 = smov %s4505_s24 }
 0xd10   :  { %2766 = vsyncpa [#allocation5], 1 }
 0xd11   :  { %2768 = vsyncpa [#allocation5 + $0x1], 1 }
 0xd12   :  { %2769 = vsyncpa [#allocation8], 1 }
 0xd13   :  { %2770 = vsyncpa [#allocation11], 1 }
 0xd14   :  { %2771 = vsyncpa [#allocation14], 1 }
 0xd15   :  { %2772 = vsyncpa [#allocation17], 1 }
 0xd16   :  { %2773 = vsyncpa [#allocation6], 1 }
 0xd17   :  { %2775 = vsyncpa [#allocation6 + $0x1], 1 }

</bundles_post_ra>
